<compile_context>
chip_gen: v6e
topology: v6e:2x2x1
jax: 0.10.0
libtpu: 0.0.40
codegen_flags: <defaults>
</compile_context>

<pallas_src>
import jax
import jax.numpy as jnp
from jax.experimental import pallas as pl
from jax.experimental.pallas import tpu as pltpu

H = 768          # base_model.config.hidden_size (hardcoded as MLP2.embedding_dim)
D1 = 512         # MLP2 hidden1 output
D2 = 768         # MLP2 hidden2 output (the "X2" features used by the transformer)
ATT_K = 100      # linear_first output features
ATT_KP = 128     # padded to lane width (padded weights/bias are exact zeros)


def _round_up(x, m):
    return ((x + m - 1) // m) * m


def _cdiv(a, b):
    return -(-a // b)


# ------------------------------------------------------------------
# Feature probe: pipeline_mode=pl.Buffered(1) on constant-index BlockSpecs.
# Probed eagerly at import (outside any jit trace) so a lowering failure can never
# leak into the real kernels; falls back to default (double-buffered) specs.
# ------------------------------------------------------------------
def _probe_buffered_support():
    try:
        const_spec = pl.BlockSpec((8, 128), lambda i: (0, 0),
                                  pipeline_mode=pl.Buffered(1))
    except Exception:
        return False

    def _probe_kernel(c_ref, x_ref, o_ref):
        o_ref[...] = x_ref[...] + c_ref[...]

    try:
        f = pl.pallas_call(
            _probe_kernel,
            out_shape=jax.ShapeDtypeStruct((16, 128), jnp.float32),
            grid=(2,),
            in_specs=[const_spec, pl.BlockSpec((8, 128), lambda i: (i, 0))],
            out_specs=pl.BlockSpec((8, 128), lambda i: (i, 0)),
        )
        jax.block_until_ready(f(jnp.zeros((8, 128), jnp.float32),
                                jnp.ones((16, 128), jnp.float32)))
        return True
    except Exception:
        return False


_BUFFERED_OK = _probe_buffered_support()


def _const_spec(shape):
    """BlockSpec for a block that is identical at every grid step (weights/biases)."""
    idx = lambda i: (0,) * len(shape)
    if _BUFFERED_OK:
        return pl.BlockSpec(shape, idx, pipeline_mode=pl.Buffered(1))
    return pl.BlockSpec(shape, idx)


# ------------------------------------------------------------------
# Kernel 1: fused MLP2 knowledge branch + knowledge mask
#   wordhiddens = use_know ? relu(relu(k_emb @ W1 + b1) @ W2 + b2) : 0
# bf16 MXU inputs, f32 accumulation, bf16 output (halves HBM writeback).
# ------------------------------------------------------------------
def _mlp2_kernel(x_ref, m_ref, w1_ref, b1_ref, w2_ref, b2_ref, o_ref):
    x = x_ref[...]                                                       # [tn, H] bf16
    h1 = jnp.dot(x, w1_ref[...], preferred_element_type=jnp.float32) + b1_ref[...]
    h1 = jnp.maximum(h1, 0.0)
    x2 = jnp.dot(h1.astype(jnp.bfloat16), w2_ref[...],
                 preferred_element_type=jnp.float32) + b2_ref[...]
    x2 = jnp.maximum(x2, 0.0)
    o_ref[...] = (x2 * m_ref[...]).astype(jnp.bfloat16)                  # mask fused in-kernel


def _pick_row_tile(n, target=1024):
    """Row tile: multiple of 8, <= target, NO artificial split for small N
    (keeps the MXU full and avoids duplicate weight DMA under megacore sharding)."""
    n8 = _round_up(n, 8)
    steps = _cdiv(n8, target) if n8 > target else 1
    tn = _round_up(_cdiv(n8, steps), 8)
    n_pad = _round_up(n8, tn)
    return tn, n_pad


def mlp2_wordhiddens(k_emb, mask, w1, b1, w2, b2):
    n = k_emb.shape[0]
    tn, n_pad = _pick_row_tile(n)
    if n_pad != n:
        k_emb = jnp.pad(k_emb, ((0, n_pad - n), (0, 0)))
        mask = jnp.pad(mask, ((0, n_pad - n), (0, 0)))
    out = pl.pallas_call(
        _mlp2_kernel,
        out_shape=jax.ShapeDtypeStruct((n_pad, D2), jnp.bfloat16),
        grid_spec=pltpu.PrefetchScalarGridSpec(
            num_scalar_prefetch=0,
            grid=(n_pad // tn,),
            in_specs=[
                pl.BlockSpec((tn, H), lambda i: (i, 0)),
                pl.BlockSpec((tn, 1), lambda i: (i, 0)),
                _const_spec((H, D1)),
                _const_spec((1, D1)),
                _const_spec((D1, D2)),
                _const_spec((1, D2)),
            ],
            out_specs=pl.BlockSpec((tn, D2), lambda i: (i, 0)),
        ),
        compiler_params=pltpu.CompilerParams(
            dimension_semantics=("parallel",)),
    )(k_emb, mask, w1, b1, w2, b2)
    return out[:n]


# ------------------------------------------------------------------
# Kernel 2: StructuredSelfAttention (r = 1), tb full sequences per grid step.
#   scores = linear_second(tanh(linear_first(x))); softmax over seq; weighted sum.
# Batched matmul over all tb*L rows, one dense [tb, H] output store.
# Position 0 is masked out of the softmax in-kernel (reference attends over [:, 1:]);
# its wordhiddens value is already zero, so its contribution to the sum is zero too.
# linear_second bias omitted: softmax is shift-invariant for r == 1 (reference fills 0).
# ------------------------------------------------------------------
def _ssa_kernel(wh_ref, w1_ref, b1_ref, w2_ref, o_ref):
    tb, L, h = wh_ref.shape
    x = wh_ref[...]                                                      # [tb, L, H] bf16
    x2d = x.reshape(tb * L, h)
    sc = jnp.tanh(
        jnp.dot(x2d, w1_ref[...], preferred_element_type=jnp.float32)
        + b1_ref[...])                                                   # [tb*L, Kp] f32
    s = jnp.sum(sc.reshape(tb, L, ATT_KP) * w2_ref[...].reshape(1, 1, ATT_KP),
                axis=-1, keepdims=True)                                  # [tb, L, 1]
    pos = jax.lax.broadcasted_iota(jnp.int32, (tb, L, 1), 1)
    s = jnp.where(pos == 0, jnp.float32(-1e30), s)                       # exclude word 0
    m = jnp.max(s, axis=1, keepdims=True)
    e = jnp.exp(s - m)
    denom = jnp.sum(e, axis=1, keepdims=True)
    a = e * pl.reciprocal(denom, approx=True)                            # [tb, L, 1]
    o_ref[...] = jnp.sum(a * x.astype(jnp.float32), axis=1)              # dense [tb, H] store


def structured_self_attention(wh, w1, b1, w2):
    b, s, h = wh.shape
    if b <= 8:
        tb, b_pad = b, b
    else:
        tb, b_pad = 8, _round_up(b, 8)
    if b_pad != b:
        wh = jnp.pad(wh, ((0, b_pad - b), (0, 0), (0, 0)))
    # VMEM estimate: double-buffered bf16 input block + weights + f32 output block.
    wbuf = 1 if _BUFFERED_OK else 2
    est = (2 * tb * s * h * 2                      # wh block, double buffered, bf16
           + wbuf * (h * ATT_KP * 2 + 2 * ATT_KP * 4)
           + 2 * tb * h * 4)
    cp_kwargs = dict(dimension_semantics=("parallel",))
    if est > (14 << 20):
        # long sequences: raise the scoped VMEM limit (stay under v7x's 64 MiB physical)
        cp_kwargs["vmem_limit_bytes"] = int(min(est + (4 << 20), 56 << 20))
    out = pl.pallas_call(
        _ssa_kernel,
        out_shape=jax.ShapeDtypeStruct((b_pad, h), jnp.float32),
        grid_spec=pltpu.PrefetchScalarGridSpec(
            num_scalar_prefetch=0,
            grid=(b_pad // tb,),
            in_specs=[
                pl.BlockSpec((tb, s, h), lambda i: (i, 0, 0)),
                _const_spec((h, ATT_KP)),
                _const_spec((1, ATT_KP)),
                _const_spec((1, ATT_KP)),
            ],
            out_specs=pl.BlockSpec((tb, h), lambda i: (i, 0)),
        ),
        compiler_params=pltpu.CompilerParams(**cp_kwargs),
    )(wh, w1, b1, w2)
    return out[:b]


# ------------------------------------------------------------------
# Parameter construction (deterministic; replaces torch inits + torch.load)
# ------------------------------------------------------------------
def init_params(key, num_classes):
    ks = jax.random.split(key, 8)

    def uni(k, shape, fan_in):
        bound = (6.0 / fan_in) ** 0.5
        return jax.random.uniform(k, shape, jnp.float32, -bound, bound)

    # TODO(synk): original code loads compat_model1 weights via torch.load(modelpath);
    #             here they are initialized deterministically instead.
    p = {
        "mlp_w1": uni(ks[0], (H, D1), H).astype(jnp.bfloat16),
        "mlp_b1": jnp.zeros((1, D1), jnp.float32),
        "mlp_w2": uni(ks[1], (D1, D2), D1).astype(jnp.bfloat16),
        "mlp_b2": jnp.zeros((1, D2), jnp.float32),
    }
    # linear_first: H -> 100 (padded to 128 with exact zeros), bias filled with 0
    w1a = uni(ks[2], (H, ATT_K), H)
    p["att_w1"] = jnp.pad(w1a, ((0, 0), (0, ATT_KP - ATT_K))).astype(jnp.bfloat16)
    p["att_b1"] = jnp.zeros((1, ATT_KP), jnp.float32)
    # linear_second: 100 -> 1 (bias 0, dropped in kernel due to softmax shift-invariance)
    w2a = uni(ks[3], (1, ATT_K), ATT_K)
    p["att_w2"] = jnp.pad(w2a, ((0, 0), (0, ATT_KP - ATT_K)))
    # self.linear: 2H -> num_classes (tiny; kept in plain JAX)
    p["head_w"] = uni(ks[4], (2 * H, num_classes), 2 * H)
    p["head_b"] = jnp.zeros((1, num_classes), jnp.float32)
    return p


# ------------------------------------------------------------------
# Full forward (glue in plain JAX, hot paths in Pallas kernels)
# ------------------------------------------------------------------
def forward(params, hiddens, input_ids, bert_member, bert_table, *,
            num_classes, method):
    B, L, h = hiddens.shape
    assert h == H

    # Replacement for the python-dict lookup `int(id) in bert_all` / `bert_all[int(id)]`.
    in_bert = bert_member[input_ids]                          # [B, L] bool
    pos = jnp.arange(L)[None, :]
    use_know = in_bert & (pos >= 1)                           # word 0 never uses knowledge
    # TODO(synk): for large workloads, fold this gather into the MLP2 kernel via
    #             scalar-prefetched input_ids instead of materializing k_emb in HBM.
    k_emb = bert_table[input_ids].astype(jnp.bfloat16)        # [B, L, H] bf16 (MXU input)
    mask = use_know.astype(jnp.float32)[..., None]            # [B, L, 1]

    # MLP2 X2 features with the knowledge mask fused in-kernel (bf16 output).
    wordhiddens = mlp2_wordhiddens(
        k_emb.reshape(B * L, H), mask.reshape(B * L, 1),
        params["mlp_w1"], params["mlp_b1"], params["mlp_w2"], params["mlp_b2"],
    ).reshape(B, L, H)                                        # [B, L, H] bf16

    # Full-sequence SSA; position 0 is masked out of the softmax in-kernel, so no
    # [:, 1:] slice copy is materialized between the two pallas_calls.
    cls_feats_knowledge = structured_self_attention(
        wordhiddens, params["att_w1"], params["att_b1"], params["att_w2"])  # [B, H] f32

    cls_feats = jnp.concatenate([hiddens[:, 0, :], cls_feats_knowledge], axis=-1)  # [B, 2H]

    if method in ("ce", "scl"):
        label_feats = None
        # TODO(synk): nn.Dropout(0.5) has no eval-time effect; implemented as identity.
        predicts = cls_feats @ params["head_w"] + params["head_b"]
    else:
        # c_all_hidden is never materialized: only rows 1..num_classes are used.
        C = num_classes
        h_slice = hiddens[:, 1:C + 1, :]                       # [B, C, H]
        second = jnp.where(use_know[:, 1:C + 1, None],
                           wordhiddens[:, 1:C + 1, :].astype(jnp.float32), h_slice)
        label_feats = jnp.concatenate([h_slice, second], axis=-1)  # [B, C, 2H]
        predicts = jnp.einsum('bd,bcd->bc', cls_feats, label_feats)

    return {"predicts": predicts, "cls_feats": cls_feats, "label_feats": label_feats}


# ------------------------------------------------------------------
if __name__ == "__main__":
    key = jax.random.PRNGKey(0)
    k_par, k_hid, k_ids, k_tab = jax.random.split(key, 4)

    B, L, VOCAB, NUM_CLASSES = 2, 8, 32, 3

    params = init_params(k_par, NUM_CLASSES)

    # synthetic base_model.last_hidden_state
    hiddens = jax.random.normal(k_hid, (B, L, H), jnp.float32)
    # synthetic token ids and synthetic bert_all (membership mask + embedding table)
    input_ids = jax.random.randint(k_ids, (B, L), 0, VOCAB)
    bert_member = (jnp.arange(VOCAB) % 3 == 0)                # every 3rd id "in bert_all"
    bert_table = jax.random.normal(k_tab, (VOCAB, H), jnp.float32)

    fwd = jax.jit(forward, static_argnames=("num_classes", "method"))

    # dual-contrastive path (einsum head)
    out_dual = fwd(params, hiddens, input_ids, bert_member, bert_table,
                   num_classes=NUM_CLASSES, method="dualcl")
    # ce path (linear head, dropout == identity at eval)
    out_ce = fwd(params, hiddens, input_ids, bert_member, bert_table,
                 num_classes=NUM_CLASSES, method="ce")

    jax.block_until_ready(out_dual["predicts"])
    jax.block_until_ready(out_dual["cls_feats"])
    jax.block_until_ready(out_dual["label_feats"])
    jax.block_until_ready(out_ce["predicts"])

    assert out_dual["predicts"].shape == (B, NUM_CLASSES)
    assert out_dual["cls_feats"].shape == (B, 2 * H)
    assert out_dual["label_feats"].shape == (B, NUM_CLASSES, 2 * H)
    assert out_ce["predicts"].shape == (B, NUM_CLASSES)
    assert bool(jnp.all(jnp.isfinite(out_dual["predicts"])))
    assert bool(jnp.all(jnp.isfinite(out_ce["predicts"])))

    print("KERNEL_OK")
</pallas_src>

<mosaic_0001>
module attributes {stable_mosaic.version = 11 : i64} {
  func.func @_probe_kernel(%arg0: i32, %arg1: memref<8x128xf32, #tpu.memory_space<vmem>>, %arg2: memref<8x128xf32, #tpu.memory_space<vmem>>, %arg3: memref<8x128xf32, #tpu.memory_space<vmem>>) attributes {dimension_semantics = [#tpu.dimension_semantics<arbitrary>], iteration_bounds = array<i64: 2>, scalar_prefetch = 0 : i64, scratch_operands = 0 : i64, tpu.core_type = #tpu.core_type<tc>, window_params = [{pipeline_mode = #tpu.pipeline_mode<synchronous>, transform_indices = @transform_0, window_bounds = array<i64: 8, 128>}, {transform_indices = @transform_1, window_bounds = array<i64: 8, 128>}, {transform_indices = @transform_2, window_bounds = array<i64: 8, 128>}]} {
    %c0 = arith.constant 0 : index
    %c0_0 = arith.constant 0 : index
    %0 = vector.load %arg2[%c0, %c0_0] : memref<8x128xf32, #tpu.memory_space<vmem>>, vector<8x128xf32>
    %c0_1 = arith.constant 0 : index
    %c0_2 = arith.constant 0 : index
    %1 = vector.load %arg1[%c0_1, %c0_2] : memref<8x128xf32, #tpu.memory_space<vmem>>, vector<8x128xf32>
    %2 = arith.addf %0, %1 : vector<8x128xf32>
    %c0_3 = arith.constant 0 : index
    %c0_4 = arith.constant 0 : index
    %3 = vector.load %arg3[%c0_3, %c0_4] : memref<8x128xf32, #tpu.memory_space<vmem>>, vector<8x128xf32>
    tpu.vector_store %arg3[%c0_3, %c0_4], %2 {strides = array<i32>} : memref<8x128xf32, #tpu.memory_space<vmem>>, vector<8x128xf32>,
    return
  }
  func.func @transform_0(%arg0: i32) -> (i32, i32) {
    %c0_i32 = arith.constant 0 : i32
    %c0_i32_0 = arith.constant 0 : i32
    %c0_i32_1 = arith.constant 0 : i32
    return %c0_i32, %c0_i32_0 : i32, i32
  }
  func.func @transform_1(%arg0: i32) -> (i32, i32) {
    %c0_i32 = arith.constant 0 : i32
    %c0_i32_0 = arith.constant 0 : i32
    return %arg0, %c0_i32 : i32, i32
  }
  func.func @transform_2(%arg0: i32) -> (i32, i32) {
    %c0_i32 = arith.constant 0 : i32
    %c0_i32_0 = arith.constant 0 : i32
    return %arg0, %c0_i32 : i32, i32
  }
}

module attributes {stable_mosaic.version = 11 : i64} {
  func.func @_mlp2_kernel(%arg0: i32, %arg1: memref<16x768xbf16, #tpu.memory_space<vmem>>, %arg2: memref<16x1xf32, #tpu.memory_space<vmem>>, %arg3: memref<768x512xbf16, #tpu.memory_space<vmem>>, %arg4: memref<1x512xf32, #tpu.memory_space<vmem>>, %arg5: memref<512x768xbf16, #tpu.memory_space<vmem>>, %arg6: memref<1x768xf32, #tpu.memory_space<vmem>>, %arg7: memref<16x768xbf16, #tpu.memory_space<vmem>>) attributes {dimension_semantics = [#tpu.dimension_semantics<parallel>], iteration_bounds = array<i64: 1>, scalar_prefetch = 0 : i64, scratch_operands = 0 : i64, tpu.core_type = #tpu.core_type<tc>, window_params = [{transform_indices = @transform_0, window_bounds = array<i64: 16, 768>}, {transform_indices = @transform_1, window_bounds = array<i64: 16, 1>}, {pipeline_mode = #tpu.pipeline_mode<synchronous>, transform_indices = @transform_2, window_bounds = array<i64: 768, 512>}, {pipeline_mode = #tpu.pipeline_mode<synchronous>, transform_indices = @transform_3, window_bounds = array<i64: 1, 512>}, {pipeline_mode = #tpu.pipeline_mode<synchronous>, transform_indices = @transform_4, window_bounds = array<i64: 512, 768>}, {pipeline_mode = #tpu.pipeline_mode<synchronous>, transform_indices = @transform_5, window_bounds = array<i64: 1, 768>}, {transform_indices = @transform_6, window_bounds = array<i64: 16, 768>}]} {
    %c0 = arith.constant 0 : index
    %c0_0 = arith.constant 0 : index
    %0 = vector.load %arg1[%c0, %c0_0] : memref<16x768xbf16, #tpu.memory_space<vmem>>, vector<16x768xbf16>
    %c0_1 = arith.constant 0 : index
    %c0_2 = arith.constant 0 : index
    %1 = vector.load %arg3[%c0_1, %c0_2] : memref<768x512xbf16, #tpu.memory_space<vmem>>, vector<768x512xbf16>
    %cst = arith.constant dense<0.000000e+00> : vector<16x512xf32>
    %2 = tpu.matmul %0, %1, %cst {dimension_numbers = #tpu.dot_dimension_numbers<[1], [0], [0], [1], [0, 0, 1, 1], [], []>} : vector<16x768xbf16>, vector<768x512xbf16>, vector<16x512xf32> -> vector<16x512xf32>
    %c0_3 = arith.constant 0 : index
    %c0_4 = arith.constant 0 : index
    %3 = vector.load %arg4[%c0_3, %c0_4] : memref<1x512xf32, #tpu.memory_space<vmem>>, vector<1x512xf32>
    %4 = vector.broadcast %3 : vector<1x512xf32> to vector<16x512xf32>
    %5 = arith.addf %2, %4 : vector<16x512xf32>
    %cst_5 = arith.constant 0.000000e+00 : f32
    %6 = vector.broadcast %cst_5 : f32 to vector<16x512xf32>
    %7 = arith.maximumf %5, %6 : vector<16x512xf32>
    %8 = arith.truncf %7 : vector<16x512xf32> to vector<16x512xbf16>
    %c0_6 = arith.constant 0 : index
    %c0_7 = arith.constant 0 : index
    %9 = vector.load %arg5[%c0_6, %c0_7] : memref<512x768xbf16, #tpu.memory_space<vmem>>, vector<512x768xbf16>
    %cst_8 = arith.constant dense<0.000000e+00> : vector<16x768xf32>
    %10 = tpu.matmul %8, %9, %cst_8 {dimension_numbers = #tpu.dot_dimension_numbers<[1], [0], [0], [1], [0, 0, 1, 1], [], []>} : vector<16x512xbf16>, vector<512x768xbf16>, vector<16x768xf32> -> vector<16x768xf32>
    %c0_9 = arith.constant 0 : index
    %c0_10 = arith.constant 0 : index
    %11 = vector.load %arg6[%c0_9, %c0_10] : memref<1x768xf32, #tpu.memory_space<vmem>>, vector<1x768xf32>
    %12 = vector.broadcast %11 : vector<1x768xf32> to vector<16x768xf32>
    %13 = arith.addf %10, %12 : vector<16x768xf32>
    %cst_11 = arith.constant 0.000000e+00 : f32
    %14 = vector.broadcast %cst_11 : f32 to vector<16x768xf32>
    %15 = arith.maximumf %13, %14 : vector<16x768xf32>
    %c0_12 = arith.constant 0 : index
    %c0_13 = arith.constant 0 : index
    %16 = vector.load %arg2[%c0_12, %c0_13] : memref<16x1xf32, #tpu.memory_space<vmem>>, vector<16x1xf32>
    %17 = vector.broadcast %16 : vector<16x1xf32> to vector<16x768xf32>
    %18 = arith.mulf %15, %17 : vector<16x768xf32>
    %19 = arith.truncf %18 : vector<16x768xf32> to vector<16x768xbf16>
    %c0_14 = arith.constant 0 : index
    %c0_15 = arith.constant 0 : index
    %20 = vector.load %arg7[%c0_14, %c0_15] : memref<16x768xbf16, #tpu.memory_space<vmem>>, vector<16x768xbf16>
    tpu.vector_store %arg7[%c0_14, %c0_15], %19 {strides = array<i32>} : memref<16x768xbf16, #tpu.memory_space<vmem>>, vector<16x768xbf16>,
    return
  }
  func.func @transform_0(%arg0: i32) -> (i32, i32) {
    %c0_i32 = arith.constant 0 : i32
    %c0_i32_0 = arith.constant 0 : i32
    return %arg0, %c0_i32 : i32, i32
  }
  func.func @transform_1(%arg0: i32) -> (i32, i32) {
    %c0_i32 = arith.constant 0 : i32
    %c0_i32_0 = arith.constant 0 : i32
    return %arg0, %c0_i32 : i32, i32
  }
  func.func @transform_2(%arg0: i32) -> (i32, i32) {
    %c0_i32 = arith.constant 0 : i32
    %c0_i32_0 = arith.constant 0 : i32
    %c0_i32_1 = arith.constant 0 : i32
    return %c0_i32, %c0_i32_0 : i32, i32
  }
  func.func @transform_3(%arg0: i32) -> (i32, i32) {
    %c0_i32 = arith.constant 0 : i32
    %c0_i32_0 = arith.constant 0 : i32
    %c0_i32_1 = arith.constant 0 : i32
    return %c0_i32, %c0_i32_0 : i32, i32
  }
  func.func @transform_4(%arg0: i32) -> (i32, i32) {
    %c0_i32 = arith.constant 0 : i32
    %c0_i32_0 = arith.constant 0 : i32
    %c0_i32_1 = arith.constant 0 : i32
    return %c0_i32, %c0_i32_0 : i32, i32
  }
  func.func @transform_5(%arg0: i32) -> (i32, i32) {
    %c0_i32 = arith.constant 0 : i32
    %c0_i32_0 = arith.constant 0 : i32
    %c0_i32_1 = arith.constant 0 : i32
    return %c0_i32, %c0_i32_0 : i32, i32
  }
  func.func @transform_6(%arg0: i32) -> (i32, i32) {
    %c0_i32 = arith.constant 0 : i32
    %c0_i32_0 = arith.constant 0 : i32
    return %arg0, %c0_i32 : i32, i32
  }
}

module attributes {stable_mosaic.version = 11 : i64} {
  func.func @_ssa_kernel(%arg0: i32, %arg1: memref<2x8x768xbf16, #tpu.memory_space<vmem>>, %arg2: memref<768x128xbf16, #tpu.memory_space<vmem>>, %arg3: memref<1x128xf32, #tpu.memory_space<vmem>>, %arg4: memref<1x128xf32, #tpu.memory_space<vmem>>, %arg5: memref<2x768xf32, #tpu.memory_space<vmem>>) attributes {dimension_semantics = [#tpu.dimension_semantics<parallel>], iteration_bounds = array<i64: 1>, scalar_prefetch = 0 : i64, scratch_operands = 0 : i64, tpu.core_type = #tpu.core_type<tc>, window_params = [{transform_indices = @transform_0, window_bounds = array<i64: 2, 8, 768>}, {pipeline_mode = #tpu.pipeline_mode<synchronous>, transform_indices = @transform_1, window_bounds = array<i64: 768, 128>}, {pipeline_mode = #tpu.pipeline_mode<synchronous>, transform_indices = @transform_2, window_bounds = array<i64: 1, 128>}, {pipeline_mode = #tpu.pipeline_mode<synchronous>, transform_indices = @transform_3, window_bounds = array<i64: 1, 128>}, {transform_indices = @transform_4, window_bounds = array<i64: 2, 768>}]} {
    %c0 = arith.constant 0 : index
    %c0_0 = arith.constant 0 : index
    %c0_1 = arith.constant 0 : index
    %0 = vector.load %arg1[%c0, %c0_0, %c0_1] : memref<2x8x768xbf16, #tpu.memory_space<vmem>>, vector<2x8x768xbf16>
    %1 = vector.shape_cast %0 : vector<2x8x768xbf16> to vector<16x768xbf16>
    %c0_2 = arith.constant 0 : index
    %c0_3 = arith.constant 0 : index
    %2 = vector.load %arg2[%c0_2, %c0_3] : memref<768x128xbf16, #tpu.memory_space<vmem>>, vector<768x128xbf16>
    %cst = arith.constant dense<0.000000e+00> : vector<16x128xf32>
    %3 = tpu.matmul %1, %2, %cst {dimension_numbers = #tpu.dot_dimension_numbers<[1], [0], [0], [1], [0, 0, 1, 1], [], []>} : vector<16x768xbf16>, vector<768x128xbf16>, vector<16x128xf32> -> vector<16x128xf32>
    %c0_4 = arith.constant 0 : index
    %c0_5 = arith.constant 0 : index
    %4 = vector.load %arg3[%c0_4, %c0_5] : memref<1x128xf32, #tpu.memory_space<vmem>>, vector<1x128xf32>
    %5 = vector.broadcast %4 : vector<1x128xf32> to vector<16x128xf32>
    %6 = arith.addf %3, %5 : vector<16x128xf32>
    %7 = math.tanh %6 : vector<16x128xf32>
    %8 = vector.shape_cast %7 : vector<16x128xf32> to vector<2x8x128xf32>
    %c0_6 = arith.constant 0 : index
    %c0_7 = arith.constant 0 : index
    %9 = vector.load %arg4[%c0_6, %c0_7] : memref<1x128xf32, #tpu.memory_space<vmem>>, vector<1x128xf32>
    %10 = vector.shape_cast %9 : vector<1x128xf32> to vector<1x1x128xf32>
    %11 = vector.broadcast %10 : vector<1x1x128xf32> to vector<2x8x128xf32>
    %12 = arith.mulf %8, %11 : vector<2x8x128xf32>
    %cst_8 = arith.constant dense<0.000000e+00> : vector<2x8xf32>
    %13 = vector.multi_reduction <add>, %12, %cst_8 [2] : vector<2x8x128xf32> to vector<2x8xf32>
    %14 = vector.shape_cast %13 : vector<2x8xf32> to vector<2x8x1xf32>
    %15 = tpu.iota {dimensions = array<i32: 1>} : vector<2x8x1xi32>
    %c0_i32 = arith.constant 0 : i32
    %16 = vector.broadcast %c0_i32 : i32 to vector<2x8x1xi32>
    %17 = arith.cmpi eq, %15, %16 : vector<2x8x1xi32>
    %cst_9 = arith.constant -1.000000e+30 : f32
    %18 = vector.broadcast %cst_9 : f32 to vector<2x8x1xf32>
    %19 = arith.select %17, %18, %14 : vector<2x8x1xi1>, vector<2x8x1xf32>
    %cst_10 = arith.constant dense<0xFF800000> : vector<2x1xf32>
    %20 = vector.multi_reduction <maximumf>, %19, %cst_10 [1] : vector<2x8x1xf32> to vector<2x1xf32>
    %21 = vector.shape_cast %20 : vector<2x1xf32> to vector<2x1x1xf32>
    %22 = vector.broadcast %21 : vector<2x1x1xf32> to vector<2x8x1xf32>
    %23 = arith.subf %19, %22 : vector<2x8x1xf32>
    %24 = math.exp %23 : vector<2x8x1xf32>
    %cst_11 = arith.constant dense<0.000000e+00> : vector<2x1xf32>
    %25 = vector.multi_reduction <add>, %24, %cst_11 [1] : vector<2x8x1xf32> to vector<2x1xf32>
    %26 = vector.shape_cast %25 : vector<2x1xf32> to vector<2x1x1xf32>
    %27 = tpu.reciprocal %26 {approx = true} : vector<2x1x1xf32> -> vector<2x1x1xf32>
    %28 = vector.broadcast %27 : vector<2x1x1xf32> to vector<2x8x1xf32>
    %29 = arith.mulf %24, %28 : vector<2x8x1xf32>
    %30 = arith.extf %0 : vector<2x8x768xbf16> to vector<2x8x768xf32>
    %31 = vector.broadcast %29 : vector<2x8x1xf32> to vector<2x8x768xf32>
    %32 = arith.mulf %31, %30 : vector<2x8x768xf32>
    %cst_12 = arith.constant dense<0.000000e+00> : vector<2x768xf32>
    %33 = vector.multi_reduction <add>, %32, %cst_12 [1] : vector<2x8x768xf32> to vector<2x768xf32>
    %c0_13 = arith.constant 0 : index
    %c0_14 = arith.constant 0 : index
    %34 = vector.load %arg5[%c0_13, %c0_14] : memref<2x768xf32, #tpu.memory_space<vmem>>, vector<2x768xf32>
    tpu.vector_store %arg5[%c0_13, %c0_14], %33 {strides = array<i32>} : memref<2x768xf32, #tpu.memory_space<vmem>>, vector<2x768xf32>,
    return
  }
  func.func @transform_0(%arg0: i32) -> (i32, i32, i32) {
    %c0_i32 = arith.constant 0 : i32
    %c0_i32_0 = arith.constant 0 : i32
    %c0_i32_1 = arith.constant 0 : i32
    return %arg0, %c0_i32, %c0_i32_0 : i32, i32, i32
  }
  func.func @transform_1(%arg0: i32) -> (i32, i32) {
    %c0_i32 = arith.constant 0 : i32
    %c0_i32_0 = arith.constant 0 : i32
    %c0_i32_1 = arith.constant 0 : i32
    return %c0_i32, %c0_i32_0 : i32, i32
  }
  func.func @transform_2(%arg0: i32) -> (i32, i32) {
    %c0_i32 = arith.constant 0 : i32
    %c0_i32_0 = arith.constant 0 : i32
    %c0_i32_1 = arith.constant 0 : i32
    return %c0_i32, %c0_i32_0 : i32, i32
  }
  func.func @transform_3(%arg0: i32) -> (i32, i32) {
    %c0_i32 = arith.constant 0 : i32
    %c0_i32_0 = arith.constant 0 : i32
    %c0_i32_1 = arith.constant 0 : i32
    return %c0_i32, %c0_i32_0 : i32, i32
  }
  func.func @transform_4(%arg0: i32) -> (i32, i32) {
    %c0_i32 = arith.constant 0 : i32
    %c0_i32_0 = arith.constant 0 : i32
    return %arg0, %c0_i32 : i32, i32
  }
}

</mosaic_0001>

<bundles_post_ra>
// kernel: tpu_custom_call.1
= control target key start
LH: loop header
LB: loop body
LE: loop exit
PB: predicated region body
PF: predicated region fallthrough
CT: control target
= control target key end

     0   :  { %7 = vsyncpa [#allocation3], 0  ;;  %s651_s0 = inlined_call_operand.hbm [shape: f32[8,128], index: 0, kind: input, shape index: {}]   ;;  %s652_s1 = inlined_call_operand.hbm [shape: f32[16,128], index: 1, kind: input, shape index: {}]   ;;  %s653_s2 = inlined_call_operand.hbm [shape: f32[16,128], index: 2, kind: output, shape index: {}]  }
   0x1   :  { %8 = vsyncpa [#allocation6], 0 }
   0x2   :  { %10 = vsyncpa [#allocation6 + $0x1], 0 }
   0x3   :  { %11 = vsyncpa [#allocation4], 0 }
   0x4   :  { %13 = vsyncpa [#allocation4 + $0x1], 0  ;;  %s485_s9 = smov 0   ;;  %s487_s10 = smov 0  }
   0x5   :  { %s489_s11 = smov 0   ;;  %s491_s12 = smov 0  }
   0x6 LB: > { %s506_s13 = sadd.s32 4294967295, %s465_s12   ;;  %s272_s14 = sadd.s32 4294967294, %s465_s12   ;;  %s465_s12 = sphi %s491_s12, %s676_s12   ;;  %s461_s11 = sphi %s489_s11, %s675_s11   ;;  %s457_s10 = sphi %s487_s10, %s674_s10   ;;  %s453_s9 = sphi %s485_s9, %s673_s9  }
   0x7   : > { %p60_p0 = scmp.ne.s32.totalorder %s457_s10, %s453_s9  ;;  %p654_p1 = scmp.eq.s32.totalorder %s506_s13, 0 }
   0x8   : > { %p90_p3 = scmp.eq.s32.totalorder %s272_s14, 1  ;;  %p273_p5 = scmp.ge.s32.totalorder %s465_s12, 1 }
   0x9   : > { %p515_p4 = por %p654_p1, %p60_p0  ;;  %p97_p7 = scmp.lt.s32.totalorder %s465_s12, 3 }
   0xa   : > { %p520_p6 = por %p90_p3, %p60_p0  ;;  %s467_s18 = smov [#allocation2]  }
   0xb   : > { %s658_s15 = scalar_select %p515_p4, 1, 0 }
   0xc   : > { %s659_s16 = scalar_select %p520_p6, 1, 0 }
   0xd   : > { %p525_p8 = pnand %p273_p5, %p97_p7  ;;  %s110_s19 = sshll.u32 %s467_s18, 4  ;;  %s111_s19 = int_to_ptr.vmem [resolvable:$true] %s110_s19 }
   0xe   : > { %s533_s20 = sadd.s32 1, %s465_s12   ;;  %s47_s24 = sadd.s32 1, %s461_s11 }
   0xf   : > { %s660_s17 = scalar_select %p525_p8, 1, 0 }
  0x10   : > { %p294_p10 = pneg %p525_p8  ;;  %s44_s22 = ssub.s32 %s465_s12, %s533_s20 }
  0x11   : > { %p543_p12 = scmp.eq.s32.totalorder %s44_s22, 0  ;;  %p54_p13 = scmp.ne.s32.totalorder %s461_s11, %s457_s10 }
  0x12   : > { %p537_p11 = pnand %p294_p10, %p654_p1  ;;  %s354_s25 = scalar_lea.vmem %s111_s19, 128 }
  0x13   : > { %p355_p3 = scmp.ne.s32.totalorder %s111_s19, %s354_s25  ;;  %p362_p9 = scmp.lt.s32.totalorder %s111_s19, %s111_s19 }
  0x14   : > { %p345_p0 = pneg %p537_p11  ;;  %p363_p2 = scmp.lt.s32.totalorder %s354_s25, %s354_s25 }
  0x16   : > { %p357_p5 = pnand %p355_p3, %p345_p0  ;;  %p364_p10 = por %p363_p2, %p362_p9 }
  0x18   : > { %p358_p7 = pneg %p357_p5 }
  0x1a   : > { %p365_p1 = pnand %p364_p10, %p358_p7 }
  0x1c   : > { %368 = shalt.err (!%p365_p1)
}
  0x1d   : > { %297 = dma.hbm_to_vmem [thread:$0]  (!%p537_p11), %s651_s0, 128, %s111_s19, [#allocation3]  }
  0x1e   : > { %s560_s28 = scalar_select %p543_p12, %s461_s11, %s47_s24  }
  0x1f   : > { %p55_p1 = scmp.eq.s32.totalorder %s465_s12, 0  ;;  %p663_p2 = scmp.eq.s32.totalorder %s506_s13, 1 }
  0x20   : > { %p307_p0 = scmp.lt.s32.totalorder %s465_s12, 2  ;;  %s121_s30 = sand.u32 1, %s461_s11  }
  0x21   : > { %p568_p9 = por %p663_p2, %p54_p13  ;;  %p56_p3 = por %p55_p1, %p54_p13 }
  0x22   : > { %s276_s3 = sshll.u32 %s121_s30, 3  ;;  %s277_s4 = sshll.u32 %s465_s12, 7 }
  0x23   : > { %s664_s29 = scalar_select %p568_p9, 1, 0 }
  0x24   : > { %s581_s7 = scalar_lea.hbm %s652_s1, %s277_s4  ;;  %s125_s8 = scalar_lea.vmem [#allocation5], %s276_s3 }
  0x25   : > { %s132_s14 = sshll.u32 %s125_s8, 4  ;;  %p583_p11 = pnand %p307_p0, %p56_p3  ;;  %s133_s14 = int_to_ptr.vmem [resolvable:$true] %s132_s14 }
  0x26   : > { %s122_s19 = scalar_lea.sflag [#allocation6], %s121_s30  ;;  %s369_s21 = scalar_lea.hbm %s581_s7, 128 }
  0x27   : > { %p370_p12 = scmp.ne.s32.totalorder %s581_s7, %s369_s21  ;;  %p371_p13 = pneg %p583_p11 }
  0x28   : > { %s374_s24 = scalar_lea.hbm %s652_s1, 256  ;;  %p375_p10 = scmp.lt.s32.totalorder %s581_s7, %s652_s1 }
  0x29   : > { %p372_p5 = pnand %p371_p13, %p370_p12  ;;  %p376_p1 = scmp.lt.s32.totalorder %s374_s24, %s369_s21 }
  0x2b   : > { %p373_p7 = pneg %p372_p5  ;;  %p377_p2 = por %p376_p1, %p375_p10 }
  0x2d   : > { %p378_p0 = pnand %p377_p2, %p373_p7 }
  0x2f   : > { %381 = shalt.err (!%p378_p0)
}
  0x30   : > { %s382_s27 = scalar_lea.vmem %s133_s14, 128  ;;  %s468_s30 = smov [#allocation5]  }
  0x31   : > { %p383_p3 = scmp.ne.s32.totalorder %s133_s14, %s382_s27  ;;  %s387_s3 = sshll.u32 %s468_s30, 4  ;;  %s388_s3 = int_to_ptr.vmem [resolvable:$false] %s387_s3 }
  0x32   : > { %s389_s4 = scalar_lea.vmem %s388_s3, 256  ;;  %p390_p12 = scmp.lt.s32.totalorder %s133_s14, %s388_s3 }
  0x33   : > { %p385_p6 = pnand %p383_p3, %p371_p13  ;;  %p391_p5 = scmp.lt.s32.totalorder %s389_s4, %s382_s27 }
  0x35   : > { %p386_p9 = pneg %p385_p6  ;;  %p392_p4 = por %p391_p5, %p390_p12 }
  0x37   : > { %p393_p8 = pnand %p392_p4, %p386_p9 }
  0x39   : > { %396 = shalt.err (!%p393_p8)
}
  0x3a   : > { %301 = dma.hbm_to_vmem [thread:$0]  (!%p583_p11), %s581_s7, 128, %s133_s14, %s122_s19  }
  0x3b   : > { %p666_p7 = scmp.ne.s32.totalorder %s660_s17, 0 }
  0x3c   : > { %p667_p10 = scmp.eq.s32.totalorder (!%p666_p7), %s506_s13, 0 }
  0x3d   : > { %141 = sbr.rel (%p666_p7) target bundleno = 96 (0x60), region = 28 }
  0x42   : > { %440 = dma.done.wait (%p667_p10), [#allocation3], 128   ;;  %p668_p6 = pmov %p667_p10 }
  0x43   : > { %s608_s5 = sand.u32 1, %s457_s10   ;;  %p669_p4 = scmp.ne.s32.totalorder %s658_s15, 0 }
  0x44   : > { %442 = vsyncadd (%p668_p6), [#allocation3], 4294967168  ;;  %s280_s6 = sshll.u32 %s608_s5, 3  ;;  %s148_s8 = scalar_lea.sflag [#allocation6], %s608_s5 }
  0x45   : > { %s151_s18 = scalar_lea.vmem [#allocation5], %s280_s6 }
  0x46   : > { %444 = dma.done.wait (%p669_p4), %s148_s8, 128  }
  0x47   : > { %446 = vsyncadd (%p669_p4), %s148_s8, 4294967168  ;;  %s171_s17 = scalar_lea.vmem [#allocation7], %s280_s6  ;;  %s283_s14 = sshll.u32 %s506_s13, 7  ;;  %v172_v0 = vld [vmem:[%s151_s18] sm:$0xff]  ;;  %v173_v1 = vld [vmem:[#allocation2] sm:$0xff] }
  0x48   : > { %s190_s7 = sshll.u32 %s171_s17, 4  ;;  %v174_v2 = vadd.f32 %v173_v1, %v172_v0  ;;  %s188_s22 = scalar_lea.hbm %s653_s2, %s283_s14  ;;  %s191_s7 = int_to_ptr.vmem [resolvable:$true] %s190_s7 }
  0x49   : > { %s177_s23 = scalar_lea.sflag [#allocation4], %s608_s5  ;;  %s397_s24 = scalar_lea.vmem %s191_s7, 128 }
  0x4a   : > { %175 = vst [vmem:[%s171_s17] sm:$0xff] %v174_v2  ;;  %p398_p8 = scmp.ne.s32.totalorder %s191_s7, %s397_s24  ;;  %p670_p9 = scmp.ne.s32.totalorder %s664_s29, 0 }
  0x4b   : > { %s469_s15 = smov [#allocation7]  }
  0x4c   : > { %p399_p11 = pnand %p398_p8, %p670_p9  ;;  %s401_s25 = sshll.u32 %s469_s15, 4  ;;  %s402_s25 = int_to_ptr.vmem [resolvable:$false] %s401_s25 }
  0x4d   : > { %s403_s26 = scalar_lea.vmem %s402_s25, 256  ;;  %p404_p1 = scmp.lt.s32.totalorder %s191_s7, %s402_s25 }
  0x4e   : > { %p400_p13 = pneg %p399_p11  ;;  %p405_p2 = scmp.lt.s32.totalorder %s403_s26, %s397_s24 }
  0x50   : > { %p406_p0 = por %p405_p2, %p404_p1 }
  0x52   : > { %p407_p3 = pnand %p406_p0, %p400_p13 }
  0x54   : > { %410 = shalt.err (!%p407_p3)
}
  0x55   : > { %s411_s13 = scalar_lea.hbm %s188_s22, 128  ;;  %s415_s3 = scalar_lea.hbm %s653_s2, 256 }
  0x56   : > { %p412_p12 = scmp.ne.s32.totalorder %s188_s22, %s411_s13  ;;  %p416_p10 = scmp.lt.s32.totalorder %s188_s22, %s653_s2 }
  0x57   : > { %p417_p6 = scmp.lt.s32.totalorder %s415_s3, %s411_s13 }
  0x58   : > { %p413_p5 = pnand %p412_p12, %p670_p9 }
  0x59   : > { %p418_p4 = por %p417_p6, %p416_p10 }
  0x5a   : > { %p414_p7 = pneg %p413_p5 }
  0x5c   : > { %p419_p8 = pnand %p418_p4, %p414_p7 }
  0x5e   : > { %422 = shalt.err (!%p419_p8)
}
  0x5f   : > { %292 = dma.vmem_to_hbm [thread:$0]  (%p670_p9), %s191_s7, 128, %s188_s22, %s177_s23  }
  0x60 PF: > { %s202_s6 = sand.u32 1, %s453_s9   ;;  %p671_p11 = scmp.ne.s32.totalorder %s659_s16, 0 }
  0x61   : > { %p672_p13 = scmp.ge.s32.totalorder %s465_s12, 2  ;;  %s203_s8 = scalar_lea.sflag [#allocation4], %s202_s6 }
  0x63   : > { %p303_p1 = pnand %p672_p13, %p671_p11 }
  0x65   : > { %p304_p2 = pneg %p303_p1 }
  0x67   : > { %448 = dma.done.wait (%p304_p2), %s203_s8, 128  }
  0x68   : > { %450 = vsyncadd (%p304_p2), %s203_s8, 4294967168  ;;  %p16_p0 = scmp.ge.s32.totalorder %s533_s20, 4   ;;  %s673_s9 = smov %s457_s10 }
  0x69   : > { %s674_s10 = smov %s461_s11  ;;  %s675_s11 = smov %s560_s28 }
  0x6a   : > { %s676_s12 = smov %s533_s20  ;;  %18 = sbr.rel (!%p16_p0) target bundleno = 6 (0x6), region = 78 }
  0x6f   :  { %208 = vsyncpa [#allocation3], 1 }
  0x70   :  { %210 = vsyncpa [#allocation3 + $0x1], 1 }
  0x71   :  { %211 = vsyncpa [#allocation6], 1 }
  0x72   :  { %213 = vsyncpa [#allocation6 + $0x1], 1 }
  0x73   :  { %214 = vsyncpa [#allocation4], 1 }
  0x74   :  { %216 = vsyncpa [#allocation4 + $0x1], 1 }

// kernel: forward.3
= control target key start
LH: loop header
LB: loop body
LE: loop exit
PB: predicated region body
PF: predicated region fallthrough
CT: control target
= control target key end

     0   :  { %vm785_vm1 = vcmask 1041409   ;;  %vm787_vm2 = vcmask 1043459   ;;  %vm789_vm3 = vcmask 1045509   ;;  %vm791_vm4 = vcmask 1047559   ;;  %s1245_s1 = inlined_call_operand.vmem [shape: bf16[768,128], index: 1, kind: input, shape index: {}]   ;;  %s1246_s0 = inlined_call_operand.vmem [shape: bf16[2,8,768], index: 0, kind: input, shape index: {}]   ;;  %s1247_s2 = inlined_call_operand.vmem [shape: f32[1,128], index: 2, kind: input, shape index: {}]   ;;  %s1248_s3 = inlined_call_operand.vmem [shape: f32[1,128], index: 3, kind: input, shape index: {}]   ;;  %s1249_s4 = inlined_call_operand.vmem [shape: f32[2,768], index: 4, kind: output, shape index: {}]  }
   0x1   :  { %v931_v0 = vld [vmem:[%s1245_s1 + $0x78] sm:$0xff]   ;;  %v935_v4 = vld [vmem:[%s1245_s1 + $0x70] sm:$0xff]   ;;  %v939_v8 = vld [vmem:[%s1245_s1 + $0x68] sm:$0xff]  }
   0x2   :  { %v932_v1 = vld [vmem:[%s1245_s1 + $0x38] sm:$0xff]   ;;  %864 = vmatprep.subr.bf16.mxu0 %v931_v0  ;;  %v936_v5 = vld [vmem:[%s1245_s1 + $0x30] sm:$0xff]   ;;  %v940_v9 = vld [vmem:[%s1245_s1 + $0x28] sm:$0xff]  }
   0x3   :  { %v933_v2 = vld [vmem:[%s1245_s1 + $0xf8] sm:$0xff]   ;;  %865 = vmatpush3.bf16.msra.mxu0 %v932_v1  ;;  %v937_v6 = vld [vmem:[%s1245_s1 + $0xf0] sm:$0xff]   ;;  %v941_v10 = vld [vmem:[%s1245_s1 + $0xe8] sm:$0xff]  }
   0x4   :  { %v934_v3 = vld [vmem:[%s1245_s1 + $0xb8] sm:$0xff]   ;;  %886 = vmatprep.subr.bf16.mxu1 %v933_v2  ;;  %866 = vmatprep.subr.bf16.mxu0 %v935_v4  ;;  %v938_v7 = vld [vmem:[%s1245_s1 + $0xb0] sm:$0xff]   ;;  %v942_v11 = vld [vmem:[%s1245_s1 + $0xa8] sm:$0xff]  }
   0x5   :  { %887 = vmatpush3.bf16.msra.mxu1 %v934_v3  ;;  %v943_v12 = vld [vmem:[%s1245_s1 + $0x60] sm:$0xff]   ;;  %v947_v16 = vld [vmem:[%s1245_s1 + $0x58] sm:$0xff]   ;;  %v951_v20 = vld [vmem:[%s1245_s1 + $0x50] sm:$0xff]  }
   0x6   :  { %888 = vmatprep.subr.bf16.mxu1 %v937_v6  ;;  %v944_v13 = vld [vmem:[%s1245_s1 + $0x20] sm:$0xff]   ;;  %v948_v17 = vld [vmem:[%s1245_s1 + $0x18] sm:$0xff]   ;;  %v952_v21 = vld [vmem:[%s1245_s1 + $0x10] sm:$0xff]  }
   0x7   :  { %867 = vmatpush3.bf16.msra.mxu0 %v936_v5  ;;  %v945_v14 = vld [vmem:[%s1245_s1 + $0xe0] sm:$0xff]   ;;  %v949_v18 = vld [vmem:[%s1245_s1 + $0xd8] sm:$0xff]   ;;  %v953_v22 = vld [vmem:[%s1245_s1 + $0xd0] sm:$0xff]  }
   0x8   :  { %868 = vmatprep.subr.bf16.mxu0 %v939_v8  ;;  %v946_v15 = vld [vmem:[%s1245_s1 + $0xa0] sm:$0xff]   ;;  %v950_v19 = vld [vmem:[%s1245_s1 + $0x98] sm:$0xff]   ;;  %v954_v23 = vld [vmem:[%s1245_s1 + $0x90] sm:$0xff]  }
   0x9   :  { %889 = vmatpush3.bf16.msra.mxu1 %v938_v7  ;;  %v955_v24 = vld [vmem:[%s1245_s1 + $0x48] sm:$0xff]   ;;  %v959_v28 = vld [vmem:[%s1245_s1 + $0x40] sm:$0xff]   ;;  %v1124_v32 = vld [vmem:[%s1246_s0 + $0x18] sm:$0xff] }
   0xa   :  { %890 = vmatprep.subr.bf16.mxu1 %v941_v10  ;;  %v956_v25 = vld [vmem:[%s1245_s1 + $0x8] sm:$0xff]   ;;  %v960_v29 = vld [vmem:[%s1245_s1] sm:$0xff]   ;;  %v965_v36 = vld [vmem:[%s1245_s1 + $0x178] sm:$0xff]  }
   0xb   :  { %869 = vmatpush3.bf16.msra.mxu0 %v940_v9  ;;  %v957_v26 = vld [vmem:[%s1245_s1 + $0xc8] sm:$0xff]   ;;  %v961_v30 = vld [vmem:[%s1245_s1 + $0xc0] sm:$0xff]   ;;  %v967_v40 = vld [vmem:[%s1245_s1 + $0x138] sm:$0xff]  }
   0xc   :  { %870 = vmatprep.subr.bf16.mxu0 %v943_v12  ;;  %v958_v27 = vld [vmem:[%s1245_s1 + $0x88] sm:$0xff]   ;;  %v1119_v31 = vld [vmem:[%s1246_s0] sm:$0xff]  ;;  %v969_v42 = vld [vmem:[%s1245_s1 + $0x170] sm:$0xff]  }
   0xd   :  { %891 = vmatpush3.bf16.msra.mxu1 %v942_v11  ;;  %v810_v33 = vcombine.high %v1119_v31, %v1124_v32  ;;  %v963_v34 = vld [vmem:[%s1245_s1 + $0x80] sm:$0xff]   ;;  %v809_v35 = vcombine.low %v1119_v31, %v1124_v32  ;;  %v1139_v37 = vld [vmem:[%s1246_s0 + $0x8] sm:$0xff]  ;;  %v970_v43 = vld [vmem:[%s1245_s1 + $0x130] sm:$0xff]  }
   0xe   :  { %892 = vmatprep.subr.bf16.mxu1 %v945_v14  ;;  %v1144_v38 = vld [vmem:[%s1246_s0 + $0x20] sm:$0xff]  ;;  %v971_v44 = vld [vmem:[%s1245_s1 + $0x168] sm:$0xff]   ;;  %v975_v48 = vld [vmem:[%s1245_s1 + $0x158] sm:$0xff]  }
   0xf   :  { %871 = vmatpush3.bf16.msra.mxu0 %v944_v13  ;;  %477 = vmatprep.mubr.bf16.mxu0 %v810_v33  ;;  %v812_v39 = vcombine.high %v1139_v37, %v1144_v38  ;;  %v811_v41 = vcombine.low %v1139_v37, %v1144_v38  ;;  %v972_v45 = vld [vmem:[%s1245_s1 + $0x128] sm:$0xff]   ;;  %v973_v46 = vld [vmem:[%s1245_s1 + $0x160] sm:$0xff]   ;;  %v976_v49 = vld [vmem:[%s1245_s1 + $0x118] sm:$0xff]  }
  0x10   :  { %872 = vmatprep.subr.bf16.mxu0 %v947_v16  ;;  %v974_v47 = vld [vmem:[%s1245_s1 + $0x120] sm:$0xff]   ;;  %v1180_v50 = vld [vmem:[%s1246_s0 + $0x10] sm:$0xff]  ;;  %v1185_v51 = vld [vmem:[%s1246_s0 + $0x28] sm:$0xff] }
  0x11   :  { %893 = vmatpush3.bf16.msra.mxu1 %v946_v15  ;;  %518 = vmatprep.mubr.bf16.mxu1 %v812_v39  ;;  %v977_v52 = vld [vmem:[%s1245_s1 + $0x150] sm:$0xff]   ;;  %v814_v53 = vcombine.high %v1180_v50, %v1185_v51  ;;  %v979_v55 = vld [vmem:[%s1245_s1 + $0x148] sm:$0xff]   ;;  %v981_v57 = vld [vmem:[%s1245_s1 + $0x140] sm:$0xff]   ;;  %v813_v59 = vcombine.low %v1180_v50, %v1185_v51 }
  0x12   :  { %894 = vmatprep.subr.bf16.mxu1 %v949_v18  ;;  %v978_v54 = vld [vmem:[%s1245_s1 + $0x110] sm:$0xff]   ;;  %v980_v56 = vld [vmem:[%s1245_s1 + $0x108] sm:$0xff]   ;;  %v982_v58 = vld [vmem:[%s1245_s1 + $0x100] sm:$0xff]  }
  0x13   :  { %873 = vmatpush3.bf16.msra.mxu0 %v948_v17  ;;  %v808_v5 = vld [vmem:[%s1247_s2] ss:$0 sm:$0xff] }
  0x14   :  { %874 = vmatprep.subr.bf16.mxu0 %v951_v20 }
  0x15   :  { %895 = vmatpush3.bf16.msra.mxu1 %v950_v19 }
  0x16   :  { %896 = vmatprep.subr.bf16.mxu1 %v953_v22  ;;  %v863_v22 = vld [vmem:[%s1248_s3] ss:$0 sm:$0xff] }
  0x17   :  { %875 = vmatpush3.bf16.msra.mxu0 %v952_v21 }
  0x18   :  { %876 = vmatprep.subr.bf16.mxu0 %v955_v24 }
  0x19   :  { %897 = vmatpush3.bf16.msra.mxu1 %v954_v23 }
  0x1a   :  { %898 = vmatprep.subr.bf16.mxu1 %v957_v26  ;;  %v583_v26 = vlaneseq }
  0x1b   :  { %877 = vmatpush3.bf16.msra.mxu0 %v956_v25 }
  0x1c   :  { %878 = vmatprep.subr.bf16.mxu0 %v959_v28 }
  0x1d   :  { %899 = vmatpush3.bf16.msra.mxu1 %v958_v27  ;;  %v1215_v27 = vshrl.u32 %v583_v26, 7 }
  0x1e   :  { %900 = vmatprep.subr.bf16.mxu1 %v961_v30 }
  0x1f   :  { %879 = vmatpush3.bf16.msra.mxu0 %v960_v29  ;;  %vm585_vm0 = vcmp.eq.s32.totalorder %v1215_v27, 0 }
  0x20   :  { %908 = vmatprep.subr.bf16.mxu0 %v965_v36 }
  0x21   :  { %901 = vmatpush3.bf16.msra.mxu1 %v963_v34 }
  0x22   :  { %478 = vmatmul.mubr.bf16.vlgmr.msra.gmra.mxu0 %v809_v35 }
  0x23   :  { %909 = vmatpush3.bf16.msra.mxu0 %v967_v40  ;;  %559 = vmatprep.mubr.bf16.mxu0 %v814_v53 }
  0x24   :  { %519 = vmatmul.mubr.bf16.vlgmr.msra.gmra.mxu1 %v811_v41  ;;  %910 = vmatprep.subr.bf16.mxu0 %v969_v42 }
  0x27   :  { %911 = vmatpush3.bf16.msra.mxu0 %v970_v43 }
  0x28   :  { %912 = vmatprep.subr.bf16.mxu0 %v971_v44 }
  0x2b   :  { %913 = vmatpush3.bf16.msra.mxu0 %v972_v45 }
  0x2c   :  { %914 = vmatprep.subr.bf16.mxu0 %v973_v46 }
  0x2f   :  { %915 = vmatpush3.bf16.msra.mxu0 %v974_v47 }
  0x30   :  { %916 = vmatprep.subr.bf16.mxu0 %v975_v48 }
  0x33   :  { %917 = vmatpush3.bf16.msra.mxu0 %v976_v49 }
  0x34   :  { %918 = vmatprep.subr.bf16.mxu0 %v977_v52 }
  0x37   :  { %919 = vmatpush3.bf16.msra.mxu0 %v978_v54 }
  0x38   :  { %920 = vmatprep.subr.bf16.mxu0 %v979_v55 }
  0x3b   :  { %921 = vmatpush3.bf16.msra.mxu0 %v980_v56 }
  0x3c   :  { %922 = vmatprep.subr.bf16.mxu0 %v981_v57 }
  0x3f   :  { %923 = vmatpush3.bf16.msra.mxu0 %v982_v58 }
  0x42   :  { %560 = vmatmul.mubr.bf16.vlgmr.msra.gmra.mxu0 %v813_v59 }
  0xe2   :  { %v880_v60 = vpop.f32.mrf.mxu0 }
  0xe4   :  { %v881_v61 = vpop.f32.mrf.mxu0  ;;  %v902_v62 = vpop.f32.mrf.mxu1 }
  0xe5   :  { %v882_v3 = vadd.f32 %v881_v61, %v880_v60 }
  0xe6   :  { %v883_v63 = vpop.f32.mrf.mxu0  ;;  %v903_v0 = vpop.f32.mrf.mxu1 }
  0xe7   :  { %v480_v9 = vadd.f32 %v882_v3, %v808_v5  ;;  %v904_v10 = vadd.f32 %v903_v0, %v902_v62 }
  0xe8   :  { %v884_v1 = vpop.f32.mrf.mxu0  ;;  %v905_v2 = vpop.f32.mrf.mxu1 }
  0xe9   :  { %v885_v4 = vadd.f32 %v884_v1, %v883_v63  ;;  %v521_v16 = vadd.f32 %v904_v10, %v480_v9  ;;  %v631_v9 = vunpack.c.h.bf16 %v1144_v38 }
  0xea   :  { %v906_v6 = vpop.f32.mrf.mxu1 }
  0xeb   :  { %v483_v11 = vadd.f32 %v885_v4, %v808_v5  ;;  %v907_v12 = vadd.f32 %v906_v6, %v905_v2  ;;  %v997_v4 = vmov 1983009808   ;;  %v628_v6 = vunpack.c.l.bf16 %v1124_v32 }
  0xec   :  { %v733_v5 = vunpack.c.l.s4 %v997_v4 }
  0xed   :  { %v524_v17 = vadd.f32 %v907_v12, %v483_v11  ;;  %v632_v11 = vunpack.c.l.bf16 %v1185_v51  ;;  %v633_v12 = vunpack.c.h.bf16 %v1185_v51 }
 0x102   :  { %v924_v7 = vpop.f32.mrf.mxu0 }
 0x104   :  { %v925_v8 = vpop.f32.mrf.mxu0 }
 0x105   :  { %v926_v14 = vadd.f32 %v925_v8, %v924_v7  ;;  %v629_v7 = vunpack.c.h.bf16 %v1124_v32  ;;  %v630_v8 = vunpack.c.l.bf16 %v1144_v38 }
 0x106   :  { %v927_v13 = vpop.f32.mrf.mxu0 }
 0x107   :  { %v562_v19 = vadd.f32 %v926_v14, %v521_v16  ;;  %v624_v16 = vunpack.c.l.bf16 %v1139_v37 }
 0x108   :  { %v928_v15 = vpop.f32.mrf.mxu0 }
 0x109   :  { %v929_v18 = vadd.f32 %v928_v15, %v927_v13  ;;  %v622_v13 = vunpack.c.l.bf16 %v1119_v31  ;;  %v623_v15 = vunpack.c.h.bf16 %v1119_v31 }
 0x10b   :  { %v565_v20 = vadd.f32 %v929_v18, %v524_v17  ;;  %v625_v17 = vunpack.c.h.bf16 %v1139_v37  ;;  %v734_v18 = vunpack.c.0.s8 %v733_v5 }
 0x10d   :  { %985 = vtanh.f32 %v565_v20 }
 0x10e   :  { %987 = vtanh.f32 %v562_v19 }
 0x11a   :  { %v986_v21 = vpop.eup %985 }
 0x11b   :  { %v578_v23 = vmul.f32 %v986_v21, %v863_v22  ;;  %v988_v24 = vpop.eup %987 }
 0x11c   :  { %v577_v25 = vmul.f32 %v988_v24, %v863_v22  ;;  %v626_v22 = vunpack.c.l.bf16 %v1180_v50 }
 0x11d   :  { %581 = vadd.xlane.f32.xlu0 %v578_v23  ;;  %v627_v23 = vunpack.c.h.bf16 %v1180_v50 }
 0x121   :  { %579 = vadd.xlane.f32.xlu0 %v577_v25 }
 0x1a6   :  { %v582_v28 = vpop.xlane.xlu0 %581 }
 0x1a7   :  { %v587_v29 = vsel %vm585_vm0, -1e+30, %v582_v28 }
 0x1a8   :  { %v594_v30 = vrot.slane %v587_v29, 4 }
 0x1aa   :  { %v595_v33 = vmax.f32 %v587_v29, %v594_v30  ;;  %v580_v34 = vpop.xlane.xlu0 %579 }
 0x1ab   :  { %v586_v35 = vsel %vm585_vm0, -1e+30, %v580_v34 }
 0x1ac   :  { %v596_v36 = vrot.slane %v595_v33, 2  ;;  %v588_v39 = vrot.slane %v586_v35, 4 }
 0x1ae   :  { %v597_v40 = vmax.f32 %v595_v33, %v596_v36  ;;  %v589_v41 = vmax.f32 %v586_v35, %v588_v39 }
 0x1b0   :  { %v598_v42 = vrot.slane %v597_v40, 1  ;;  %v590_v43 = vrot.slane %v589_v41, 2 }
 0x1b2   :  { %v599_v44 = vmax.f32 %v597_v40, %v598_v42  ;;  %v591_v45 = vmax.f32 %v589_v41, %v590_v43 }
 0x1b4   :  { %v601_v46 = vsub.f32 %v587_v29, %v599_v44  ;;  %v592_v47 = vrot.slane %v591_v45, 1  ;;  %v1231_v29 = vsub.s32 %v734_v18, %v1215_v27 }
 0x1b6   :  { %v604_v48 = vmul.f32 1.442695, %v601_v46  ;;  %v593_v49 = vmax.f32 %v591_v45, %v592_v47 }
 0x1b8   :  { %989 = vpow2.f32 %v604_v48  ;;  %v600_v52 = vsub.f32 %v586_v35, %v593_v49 }
 0x1ba   :  { %v602_v53 = vmul.f32 1.442695, %v600_v52 }
 0x1bc   :  { %991 = vpow2.f32 %v602_v53 }
 0x1c5   :  { %v990_v54 = vpop.eup %989 }
 0x1c6   :  { %v612_v55 = vrot.slane %v990_v54, 4 }
 0x1c8   :  { %v613_v56 = vadd.f32 %v990_v54, %v612_v55 }
 0x1c9   :  { %v992_v57 = vpop.eup %991 }
 0x1ca   :  { %v614_v58 = vrot.slane %v613_v56, 2  ;;  %v606_v59 = vrot.slane %v992_v57, 4 }
 0x1cc   :  { %v615_v60 = vadd.f32 %v614_v58, %v613_v56  ;;  %v607_v61 = vadd.f32 %v992_v57, %v606_v59 }
 0x1ce   :  { %v616_v62 = vrot.slane %v615_v60, 1  ;;  %v608_v63 = vrot.slane %v607_v61, 2 }
 0x1d0   :  { %v617_v0 = vadd.f32 %v616_v62, %v615_v60  ;;  %v609_v1 = vadd.f32 %v608_v63, %v607_v61 }
 0x1d2   :  { %993 = vrcp.f32 %v617_v0  ;;  %v610_v2 = vrot.slane %v609_v1, 1 }
 0x1d4   :  { %v611_v3 = vadd.f32 %v610_v2, %v609_v1 }
 0x1d6   :  { %995 = vrcp.f32 %v611_v3 }
 0x1df   :  { %v994_v10 = vpop.eup %993 }
 0x1e0   :  { %v621_v14 = vmul.f32 %v994_v10, %v990_v54 }
 0x1e2   :  { %v640_v32 = vmul.f32 %v628_v6, %v621_v14  ;;  %v641_v19 = vmul.f32 %v629_v7, %v621_v14  ;;  %v642_v20 = vmul.f32 %v630_v8, %v621_v14  ;;  %v643_v21 = vmul.f32 %v631_v9, %v621_v14 }
 0x1e3   :  { %v996_v38 = vpop.eup %995  ;;  %v644_v51 = vmul.f32 %v632_v11, %v621_v14  ;;  %v645_v24 = vmul.f32 %v633_v12, %v621_v14 }
 0x1e4   :  { %v682_v25 = vrot.slane %v640_v32, 4  ;;  %v688_v26 = vrot.slane %v641_v19, 4  ;;  %v694_v28 = vrot.slane %v642_v20, 4  ;;  %v700_v31 = vrot.slane %v643_v21, 4 }
 0x1e5   :  { %v706_v37 = vrot.slane %v644_v51, 4  ;;  %v712_v30 = vrot.slane %v645_v24, 4  ;;  %v620_v33 = vmul.f32 %v996_v38, %v992_v57 }
 0x1e6   :  { %v683_v34 = vadd.f32 %v682_v25, %v640_v32  ;;  %v689_v35 = vadd.f32 %v688_v26, %v641_v19  ;;  %v695_v36 = vadd.f32 %v694_v28, %v642_v20  ;;  %v701_v39 = vadd.f32 %v700_v31, %v643_v21 }
 0x1e7   :  { %v707_v40 = vadd.f32 %v706_v37, %v644_v51  ;;  %v713_v41 = vadd.f32 %v712_v30, %v645_v24  ;;  %v634_v42 = vmul.f32 %v622_v13, %v620_v33  ;;  %v635_v50 = vmul.f32 %v623_v15, %v620_v33 }
 0x1e8   :  { %v684_v43 = vrot.slane %v683_v34, 2  ;;  %v690_v44 = vrot.slane %v689_v35, 2  ;;  %v696_v45 = vrot.slane %v695_v36, 2  ;;  %v702_v46 = vrot.slane %v701_v39, 2 }
 0x1e9   :  { %v708_v47 = vrot.slane %v707_v40, 2  ;;  %v714_v48 = vrot.slane %v713_v41, 2  ;;  %v636_v49 = vmul.f32 %v624_v16, %v620_v33  ;;  %v637_v27 = vmul.f32 %v625_v17, %v620_v33 }
 0x1ea   :  { %v685_v52 = vadd.f32 %v684_v43, %v683_v34  ;;  %v691_v53 = vadd.f32 %v690_v44, %v689_v35  ;;  %v697_v54 = vadd.f32 %v696_v45, %v695_v36  ;;  %v703_v55 = vadd.f32 %v702_v46, %v701_v39 }
 0x1eb   :  { %v709_v56 = vadd.f32 %v708_v47, %v707_v40  ;;  %v715_v57 = vadd.f32 %v714_v48, %v713_v41  ;;  %v638_v58 = vmul.f32 %v626_v22, %v620_v33  ;;  %v639_v59 = vmul.f32 %v627_v23, %v620_v33 }
 0x1ec   :  { %v686_v60 = vrot.slane %v685_v52, 1  ;;  %v692_v61 = vrot.slane %v691_v53, 1  ;;  %v698_v62 = vrot.slane %v697_v54, 1  ;;  %v704_v63 = vrot.slane %v703_v55, 1 }
 0x1ed   :  { %v710_v0 = vrot.slane %v709_v56, 1  ;;  %v716_v1 = vrot.slane %v715_v57, 1  ;;  %v646_v2 = vrot.slane %v634_v42, 4  ;;  %v652_v3 = vrot.slane %v635_v50, 4 }
 0x1ee   :  { %v687_v4 = vadd.f32 %v686_v60, %v685_v52  ;;  %v693_v5 = vadd.f32 %v692_v61, %v691_v53  ;;  %v699_v6 = vadd.f32 %v698_v62, %v697_v54  ;;  %v705_v7 = vadd.f32 %v704_v63, %v703_v55 }
 0x1ef   :  { %v711_v8 = vadd.f32 %v710_v0, %v709_v56  ;;  %v717_v9 = vadd.f32 %v716_v1, %v715_v57  ;;  %v647_v10 = vadd.f32 %v646_v2, %v634_v42  ;;  %v653_v11 = vadd.f32 %v652_v3, %v635_v50 }
 0x1f0   :  { %v755_v12 = vcombine.low %v687_v4, %v693_v5  ;;  %v756_v13 = vcombine.low %v699_v6, %v705_v7  ;;  %v658_v14 = vrot.slane %v636_v49, 4  ;;  %v664_v15 = vrot.slane %v637_v27, 4 }
 0x1f1   :  { %v772_v16 = vcombine.low %v711_v8, %v717_v9  ;;  %v648_v17 = vrot.slane %v647_v10, 2  ;;  %v654_v18 = vrot.slane %v653_v11, 2  ;;  %v670_v32 = vrot.slane %v638_v58, 4 }
 0x1f2   :  { %v763_v19 = vrot.slane %v755_v12, %v1231_v29  ;;  %v770_v20 = vrot.slane %v756_v13, %v1231_v29  ;;  %v659_v21 = vadd.f32 %v658_v14, %v636_v49  ;;  %v665_v38 = vadd.f32 %v664_v15, %v637_v27 }
 0x1f3   :  { %v779_v22 = vrot.slane %v772_v16, %v1231_v29  ;;  %v649_v23 = vadd.f32 %v648_v17, %v647_v10  ;;  %v655_v51 = vadd.f32 %v654_v18, %v653_v11  ;;  %v671_v24 = vadd.f32 %v670_v32, %v638_v58 }
 0x1f4   :  { %v771_v25 = vcombine.low %v763_v19, %v770_v20  ;;  %v660_v26 = vrot.slane %v659_v21, 2  ;;  %v666_v28 = vrot.slane %v665_v38, 2  ;;  %v676_v31 = vrot.slane %v639_v59, 4 }
 0x1f5   :  { %v650_v37 = vrot.slane %v649_v23, 1  ;;  %v656_v30 = vrot.slane %v655_v51, 1  ;;  %v672_v33 = vrot.slane %v671_v24, 2 }
 0x1f6   :  { %v661_v34 = vadd.f32 %v660_v26, %v659_v21  ;;  %v667_v35 = vadd.f32 %v666_v28, %v665_v38  ;;  %v677_v36 = vadd.f32 %v676_v31, %v639_v59  ;;  %v784_v56 = vrot.slane %v771_v25, 7 }
 0x1f7   :  { %v651_v39 = vadd.f32 %v650_v37, %v649_v23  ;;  %v657_v40 = vadd.f32 %v656_v30, %v655_v51  ;;  %v673_v41 = vadd.f32 %v672_v33, %v671_v24  ;;  %v795_v59 = vrot.slane %v779_v22, 7 }
 0x1f8   :  { %v662_v42 = vrot.slane %v661_v34, 1  ;;  %v668_v50 = vrot.slane %v667_v35, 1  ;;  %v678_v43 = vrot.slane %v677_v36, 2 }
 0x1f9   :  { %v674_v44 = vrot.slane %v673_v41, 1  ;;  %v730_v45 = vcombine.low %v651_v39, %v657_v40 }
 0x1fa   :  { %v663_v46 = vadd.f32 %v662_v42, %v661_v34  ;;  %v669_v47 = vadd.f32 %v668_v50, %v667_v35  ;;  %v679_v48 = vadd.f32 %v678_v43, %v677_v36 }
 0x1fb   :  { %v738_v49 = vrot.slane %v730_v45, %v1231_v29  ;;  %v675_v27 = vadd.f32 %v674_v44, %v673_v41 }
 0x1fc   :  { %v680_v52 = vrot.slane %v679_v48, 1  ;;  %v731_v53 = vcombine.low %v663_v46, %v669_v47 }
 0x1fe   :  { %v681_v54 = vadd.f32 %v680_v52, %v679_v48  ;;  %v745_v55 = vrot.slane %v731_v53, %v1231_v29 }
 0x200   :  { %v746_v57 = vcombine.low %v738_v49, %v745_v55  ;;  %v747_v58 = vcombine.low %v675_v27, %v681_v54 }
 0x202   :  { %v754_v60 = vrot.slane %v747_v58, %v1231_v29  ;;  %v786_v61 = vsel %vm785_vm1, %v784_v56, %v746_v57 }
 0x203   :  { %v788_v62 = vsel %vm787_vm2, %v784_v56, %v786_v61 }
 0x204   :  { %v790_v63 = vsel %vm789_vm3, %v784_v56, %v788_v62  ;;  %v796_v0 = vsel %vm785_vm1, %v795_v59, %v754_v60 }
 0x205   :  { %v792_v1 = vsel %vm791_vm4, %v784_v56, %v790_v63  ;;  %v797_v2 = vsel %vm787_vm2, %v795_v59, %v796_v0 }
 0x206   :  { %v798_v3 = vsel %vm789_vm3, %v795_v59, %v797_v2  ;;  %802 = vst [vmem:[%s1249_s4] sm:$0xff] %v792_v1 }
 0x207   :  { %v799_v4 = vsel %vm791_vm4, %v795_v59, %v798_v3 }
 0x208   :  { %803 = vst [vmem:[%s1249_s4 + $0x8] sm:$0xf] %v799_v4 }

// kernel: forward.2
= control target key start
LH: loop header
LB: loop body
LE: loop exit
PB: predicated region body
PF: predicated region fallthrough
CT: control target
= control target key end

     0   :  { %11 = vsyncpa [#allocation3], 0  ;;  %s4057_s21 = smov [#allocation2]   ;;  %s4816_s0 = inlined_call_operand.vmem [shape: bf16[16,768], index: 0, kind: input, shape index: {}]   ;;  %s4817_s1 = inlined_call_operand.vmem [shape: f32[16,1], index: 1, kind: input, shape index: {}]   ;;  %s4818_s2 = inlined_call_operand.vmem [shape: bf16[768,512], index: 2, kind: input, shape index: {}]   ;;  %s4819_s3 = inlined_call_operand.vmem [shape: f32[1,512], index: 3, kind: input, shape index: {}]   ;;  %s4820_s4 = inlined_call_operand.hbm [shape: bf16[512,768], index: 4, kind: input, shape index: {}]   ;;  %s4821_s5 = inlined_call_operand.vmem [shape: f32[1,768], index: 5, kind: input, shape index: {}]   ;;  %s4822_s6 = inlined_call_operand.vmem [shape: bf16[16,768], index: 6, kind: output, shape index: {}]  }
   0x1   :  { %s25_s22 = sshll.u32 %s4057_s21, 4  ;;  %s26_s22 = int_to_ptr.vmem [resolvable:$true] %s25_s22 }
   0x2   :  { %s4043_s23 = scalar_lea.vmem %s26_s22, 24576  ;;  %p4048_p1 = scmp.lt.s32.totalorder %s26_s22, %s26_s22 }
   0x3   :  { %p4044_p0 = scmp.ne.s32.totalorder %s26_s22, %s4043_s23  ;;  %p4049_p2 = scmp.lt.s32.totalorder %s4043_s23, %s4043_s23 }
   0x5   :  { %p4050_p3 = por %p4049_p2, %p4048_p1 }
   0x7   :  { %p4051_p4 = pnand %p4050_p3, %p4044_p0 }
   0x9   :  { %4054 = shalt.err (!%p4051_p4)
}
   0xa   :  { %s4058_s24 = smov 384   ;;  %s4059_s25 = smov 24  }
   0xb   :  { %31 = dma.hbm_to_vmem [thread:$0]  %s4820_s4, 24576, %s26_s22, [#allocation3], %s4058_s24, %s4058_s24, %s4059_s25  }
   0xc   :  { %4055 = dma.done.wait [#allocation3], 24576  }
   0xd   :  { %4056 = vsyncadd [#allocation3], 4294942720  ;;  %v3449_v0 = vld [vmem:[%s4818_s2 + $0xe4] ss:$16 sps:$4 sm:$0xff]   ;;  %v3453_v2 = vld [vmem:[%s4818_s2 + $0xe0] ss:$16 sps:$4 sm:$0xff]  }
   0xe   :  { %v3451_v1 = vld [vmem:[%s4818_s2 + $0x2e4] ss:$16 sps:$4 sm:$0xff]   ;;  %1247 = vmatprep.subr.bf16.mxu0 %v3449_v0  ;;  %v3454_v3 = vld [vmem:[%s4818_s2 + $0x2e0] ss:$16 sps:$4 sm:$0xff]  }
   0xf   :  { %1290 = vmatprep.subr.bf16.mxu1 %v3451_v1  ;;  %v3455_v4 = vld [vmem:[%s4818_s2 + $0xc4] ss:$16 sps:$4 sm:$0xff]   ;;  %1248 = vmatpush1.bf16.msra.mxu0 %v3453_v2  ;;  %v3459_v6 = vld [vmem:[%s4818_s2 + $0xc0] ss:$16 sps:$4 sm:$0xff]  }
  0x10   :  { %1291 = vmatpush1.bf16.msra.mxu1 %v3454_v3  ;;  %v3457_v5 = vld [vmem:[%s4818_s2 + $0x2c4] ss:$16 sps:$4 sm:$0xff]   ;;  %1249 = vmatprep.subr.bf16.mxu0 %v3455_v4  ;;  %v3460_v7 = vld [vmem:[%s4818_s2 + $0x2c0] ss:$16 sps:$4 sm:$0xff]   ;;  %v3556_v3 = vld [vmem:[%s4818_s2 + $0xec] ss:$16 sps:$4 sm:$0xff]  }
  0x11   :  { %1292 = vmatprep.subr.bf16.mxu1 %v3457_v5  ;;  %v3461_v8 = vld [vmem:[%s4818_s2 + $0xa4] ss:$16 sps:$4 sm:$0xff]   ;;  %v3465_v10 = vld [vmem:[%s4818_s2 + $0xa0] ss:$16 sps:$4 sm:$0xff]  }
  0x12   :  { %v3463_v9 = vld [vmem:[%s4818_s2 + $0x2a4] ss:$16 sps:$4 sm:$0xff]   ;;  %v3466_v11 = vld [vmem:[%s4818_s2 + $0x2a0] ss:$16 sps:$4 sm:$0xff]  }
  0x13   :  { %1250 = vmatpush1.bf16.msra.mxu0 %v3459_v6  ;;  %v3467_v12 = vld [vmem:[%s4818_s2 + $0x84] ss:$16 sps:$4 sm:$0xff]   ;;  %v3471_v14 = vld [vmem:[%s4818_s2 + $0x80] ss:$16 sps:$4 sm:$0xff]  }
  0x14   :  { %1293 = vmatpush1.bf16.msra.mxu1 %v3460_v7  ;;  %1251 = vmatprep.subr.bf16.mxu0 %v3461_v8  ;;  %v3469_v13 = vld [vmem:[%s4818_s2 + $0x284] ss:$16 sps:$4 sm:$0xff]   ;;  %v3472_v15 = vld [vmem:[%s4818_s2 + $0x280] ss:$16 sps:$4 sm:$0xff]   ;;  %v3554_v7 = vld [vmem:[%s4818_s2 + $0xe8] ss:$16 sps:$4 sm:$0xff]  }
  0x15   :  { %1294 = vmatprep.subr.bf16.mxu1 %v3463_v9  ;;  %v3473_v16 = vld [vmem:[%s4818_s2 + $0x64] ss:$16 sps:$4 sm:$0xff]   ;;  %v3477_v18 = vld [vmem:[%s4818_s2 + $0x60] ss:$16 sps:$4 sm:$0xff]   ;;  %v3562_v9 = vld [vmem:[%s4818_s2 + $0xcc] ss:$16 sps:$4 sm:$0xff]  }
  0x16   :  { %v3475_v17 = vld [vmem:[%s4818_s2 + $0x264] ss:$16 sps:$4 sm:$0xff]   ;;  %v3478_v19 = vld [vmem:[%s4818_s2 + $0x260] ss:$16 sps:$4 sm:$0xff]  }
  0x17   :  { %1252 = vmatpush1.bf16.msra.mxu0 %v3465_v10  ;;  %v3479_v20 = vld [vmem:[%s4818_s2 + $0x44] ss:$16 sps:$4 sm:$0xff]   ;;  %v3483_v22 = vld [vmem:[%s4818_s2 + $0x40] ss:$16 sps:$4 sm:$0xff]  }
  0x18   :  { %1295 = vmatpush1.bf16.msra.mxu1 %v3466_v11  ;;  %1253 = vmatprep.subr.bf16.mxu0 %v3467_v12  ;;  %v3481_v21 = vld [vmem:[%s4818_s2 + $0x244] ss:$16 sps:$4 sm:$0xff]   ;;  %v3484_v23 = vld [vmem:[%s4818_s2 + $0x240] ss:$16 sps:$4 sm:$0xff]   ;;  %v3560_v11 = vld [vmem:[%s4818_s2 + $0xc8] ss:$16 sps:$4 sm:$0xff]  }
  0x19   :  { %1296 = vmatprep.subr.bf16.mxu1 %v3469_v13  ;;  %v3485_v24 = vld [vmem:[%s4818_s2 + $0x24] ss:$16 sps:$4 sm:$0xff]   ;;  %v3489_v26 = vld [vmem:[%s4818_s2 + $0x20] ss:$16 sps:$4 sm:$0xff]   ;;  %v3568_v13 = vld [vmem:[%s4818_s2 + $0xac] ss:$16 sps:$4 sm:$0xff]  }
  0x1a   :  { %v3487_v25 = vld [vmem:[%s4818_s2 + $0x224] ss:$16 sps:$4 sm:$0xff]   ;;  %v3490_v27 = vld [vmem:[%s4818_s2 + $0x220] ss:$16 sps:$4 sm:$0xff]  }
  0x1b   :  { %1254 = vmatpush1.bf16.msra.mxu0 %v3471_v14  ;;  %v3491_v28 = vld [vmem:[%s4818_s2 + $0x4] ss:$16 sps:$4 sm:$0xff]   ;;  %v3495_v30 = vld [vmem:[%s4818_s2] ss:$16 sps:$4 sm:$0xff]  }
  0x1c   :  { %1297 = vmatpush1.bf16.msra.mxu1 %v3472_v15  ;;  %1255 = vmatprep.subr.bf16.mxu0 %v3473_v16  ;;  %v3493_v29 = vld [vmem:[%s4818_s2 + $0x204] ss:$16 sps:$4 sm:$0xff]   ;;  %v3496_v31 = vld [vmem:[%s4818_s2 + $0x200] ss:$16 sps:$4 sm:$0xff]   ;;  %v3566_v15 = vld [vmem:[%s4818_s2 + $0xa8] ss:$16 sps:$4 sm:$0xff]  }
  0x1d   :  { %1298 = vmatprep.subr.bf16.mxu1 %v3475_v17  ;;  %v3497_v32 = vld [vmem:[%s4818_s2 + $0x1e4] ss:$16 sps:$4 sm:$0xff]   ;;  %v3501_v34 = vld [vmem:[%s4818_s2 + $0x1e0] ss:$16 sps:$4 sm:$0xff]   ;;  %v3574_v17 = vld [vmem:[%s4818_s2 + $0x8c] ss:$16 sps:$4 sm:$0xff]  }
  0x1e   :  { %v3499_v33 = vld [vmem:[%s4818_s2 + $0x3e4] ss:$16 sps:$4 sm:$0xff]   ;;  %v3502_v35 = vld [vmem:[%s4818_s2 + $0x3e0] ss:$16 sps:$4 sm:$0xff]  }
  0x1f   :  { %1256 = vmatpush1.bf16.msra.mxu0 %v3477_v18  ;;  %v3503_v36 = vld [vmem:[%s4818_s2 + $0x1c4] ss:$16 sps:$4 sm:$0xff]   ;;  %v3507_v38 = vld [vmem:[%s4818_s2 + $0x1c0] ss:$16 sps:$4 sm:$0xff]  }
  0x20   :  { %1299 = vmatpush1.bf16.msra.mxu1 %v3478_v19  ;;  %1257 = vmatprep.subr.bf16.mxu0 %v3479_v20  ;;  %v3505_v37 = vld [vmem:[%s4818_s2 + $0x3c4] ss:$16 sps:$4 sm:$0xff]   ;;  %v3508_v39 = vld [vmem:[%s4818_s2 + $0x3c0] ss:$16 sps:$4 sm:$0xff]   ;;  %v3572_v19 = vld [vmem:[%s4818_s2 + $0x88] ss:$16 sps:$4 sm:$0xff]  }
  0x21   :  { %1300 = vmatprep.subr.bf16.mxu1 %v3481_v21  ;;  %v3509_v40 = vld [vmem:[%s4818_s2 + $0x1a4] ss:$16 sps:$4 sm:$0xff]   ;;  %v3513_v42 = vld [vmem:[%s4818_s2 + $0x1a0] ss:$16 sps:$4 sm:$0xff]   ;;  %v3580_v21 = vld [vmem:[%s4818_s2 + $0x6c] ss:$16 sps:$4 sm:$0xff]  }
  0x22   :  { %v3511_v41 = vld [vmem:[%s4818_s2 + $0x3a4] ss:$16 sps:$4 sm:$0xff]   ;;  %v3514_v43 = vld [vmem:[%s4818_s2 + $0x3a0] ss:$16 sps:$4 sm:$0xff]  }
  0x23   :  { %1258 = vmatpush1.bf16.msra.mxu0 %v3483_v22  ;;  %v3515_v44 = vld [vmem:[%s4818_s2 + $0x184] ss:$16 sps:$4 sm:$0xff]   ;;  %v3519_v46 = vld [vmem:[%s4818_s2 + $0x180] ss:$16 sps:$4 sm:$0xff]  }
  0x24   :  { %1301 = vmatpush1.bf16.msra.mxu1 %v3484_v23  ;;  %1259 = vmatprep.subr.bf16.mxu0 %v3485_v24  ;;  %v3517_v45 = vld [vmem:[%s4818_s2 + $0x384] ss:$16 sps:$4 sm:$0xff]   ;;  %v3520_v47 = vld [vmem:[%s4818_s2 + $0x380] ss:$16 sps:$4 sm:$0xff]   ;;  %v3578_v23 = vld [vmem:[%s4818_s2 + $0x68] ss:$16 sps:$4 sm:$0xff]  }
  0x25   :  { %1302 = vmatprep.subr.bf16.mxu1 %v3487_v25  ;;  %v3521_v48 = vld [vmem:[%s4818_s2 + $0x164] ss:$16 sps:$4 sm:$0xff]   ;;  %v3525_v52 = vld [vmem:[%s4818_s2 + $0x160] ss:$16 sps:$4 sm:$0xff]   ;;  %v3586_v25 = vld [vmem:[%s4818_s2 + $0x4c] ss:$16 sps:$4 sm:$0xff]  }
  0x26   :  { %v3547_v49 = vld [vmem:[%s4816_s0 + $0x4] ss:$24 sps:$4 sm:$0xff]   ;;  %v3526_v53 = vld [vmem:[%s4818_s2 + $0x360] ss:$16 sps:$4 sm:$0xff]  }
  0x27   :  { %1260 = vmatpush1.bf16.msra.mxu0 %v3489_v26  ;;  %v3523_v50 = vld [vmem:[%s4818_s2 + $0x364] ss:$16 sps:$4 sm:$0xff]   ;;  %1279 = vmatprep.mubr.bf16.mxu0 %v3547_v49  ;;  %v3531_v56 = vld [vmem:[%s4818_s2 + $0x140] ss:$16 sps:$4 sm:$0xff]  }
  0x28   :  { %1303 = vmatpush1.bf16.msra.mxu1 %v3490_v27  ;;  %1261 = vmatprep.subr.bf16.mxu0 %v3491_v28  ;;  %v4255_v51 = vld [vmem:[%s4816_s0 + $0xc] ss:$24 sps:$4 sm:$0xff]   ;;  %v3532_v57 = vld [vmem:[%s4818_s2 + $0x340] ss:$16 sps:$4 sm:$0xff]   ;;  %v3584_v27 = vld [vmem:[%s4818_s2 + $0x48] ss:$16 sps:$4 sm:$0xff]  }
  0x29   :  { %1304 = vmatprep.subr.bf16.mxu1 %v3493_v29  ;;  %1322 = vmatprep.mubr.bf16.mxu1 %v4255_v51  ;;  %v3527_v54 = vld [vmem:[%s4818_s2 + $0x144] ss:$16 sps:$4 sm:$0xff]   ;;  %v3537_v60 = vld [vmem:[%s4818_s2 + $0x120] ss:$16 sps:$4 sm:$0xff]   ;;  %v3592_v29 = vld [vmem:[%s4818_s2 + $0x2c] ss:$16 sps:$4 sm:$0xff]  }
  0x2a   :  { %v3529_v55 = vld [vmem:[%s4818_s2 + $0x344] ss:$16 sps:$4 sm:$0xff]   ;;  %v3538_v61 = vld [vmem:[%s4818_s2 + $0x320] ss:$16 sps:$4 sm:$0xff]  }
  0x2b   :  { %1262 = vmatpush1.bf16.msra.mxu0 %v3495_v30  ;;  %v3533_v58 = vld [vmem:[%s4818_s2 + $0x124] ss:$16 sps:$4 sm:$0xff]   ;;  %v3543_v0 = vld [vmem:[%s4818_s2 + $0x100] ss:$16 sps:$4 sm:$0xff]  }
  0x2c   :  { %1305 = vmatpush1.bf16.msra.mxu1 %v3496_v31  ;;  %1263 = vmatprep.subr.bf16.mxu0 %v3497_v32  ;;  %v3535_v59 = vld [vmem:[%s4818_s2 + $0x324] ss:$16 sps:$4 sm:$0xff]   ;;  %v3544_v1 = vld [vmem:[%s4818_s2 + $0x300] ss:$16 sps:$4 sm:$0xff]   ;;  %v3590_v31 = vld [vmem:[%s4818_s2 + $0x28] ss:$16 sps:$4 sm:$0xff]  }
  0x2d   :  { %1306 = vmatprep.subr.bf16.mxu1 %v3499_v33  ;;  %v3539_v62 = vld [vmem:[%s4818_s2 + $0x104] ss:$16 sps:$4 sm:$0xff]   ;;  %v4309_v4 = vld [vmem:[%s4816_s0] ss:$24 sps:$4 sm:$0xff]   ;;  %v3598_v33 = vld [vmem:[%s4818_s2 + $0xc] ss:$16 sps:$4 sm:$0xff]  }
  0x2e   :  { %v3541_v63 = vld [vmem:[%s4818_s2 + $0x304] ss:$16 sps:$4 sm:$0xff]   ;;  %v3548_v5 = vld [vmem:[%s4816_s0 + $0x8] ss:$24 sps:$4 sm:$0xff]  }
  0x2f   :  { %1264 = vmatpush2.bf16.msra.mxu0 %v3501_v34  ;;  %v3553_v2 = vld [vmem:[%s4818_s2 + $0x4e4] ss:$16 sps:$4 sm:$0xff]   ;;  %v3551_v6 = vld [vmem:[%s4818_s2 + $0x4e0] ss:$16 sps:$4 sm:$0xff]  }
  0x30   :  { %1307 = vmatpush2.bf16.msra.mxu1 %v3502_v35  ;;  %1265 = vmatprep.subr.bf16.mxu0 %v3503_v36  ;;  %v3559_v8 = vld [vmem:[%s4818_s2 + $0x4c4] ss:$16 sps:$4 sm:$0xff]   ;;  %v3557_v10 = vld [vmem:[%s4818_s2 + $0x4c0] ss:$16 sps:$4 sm:$0xff]   ;;  %v3596_v36 = vld [vmem:[%s4818_s2 + $0x8] ss:$16 sps:$4 sm:$0xff]  }
  0x31   :  { %1308 = vmatprep.subr.bf16.mxu1 %v3505_v37  ;;  %v3565_v12 = vld [vmem:[%s4818_s2 + $0x4a4] ss:$16 sps:$4 sm:$0xff]   ;;  %v3563_v14 = vld [vmem:[%s4818_s2 + $0x4a0] ss:$16 sps:$4 sm:$0xff]  }
  0x32   :  { %v3571_v16 = vld [vmem:[%s4818_s2 + $0x484] ss:$16 sps:$4 sm:$0xff]   ;;  %v3569_v18 = vld [vmem:[%s4818_s2 + $0x480] ss:$16 sps:$4 sm:$0xff]  }
  0x33   :  { %1266 = vmatpush2.bf16.msra.mxu0 %v3507_v38  ;;  %v3577_v20 = vld [vmem:[%s4818_s2 + $0x464] ss:$16 sps:$4 sm:$0xff]   ;;  %v3575_v22 = vld [vmem:[%s4818_s2 + $0x460] ss:$16 sps:$4 sm:$0xff]   ;;  %v3604_v38 = vld [vmem:[%s4818_s2 + $0x1ec] ss:$16 sps:$4 sm:$0xff]  }
  0x34   :  { %1309 = vmatpush2.bf16.msra.mxu1 %v3508_v39  ;;  %1267 = vmatprep.subr.bf16.mxu0 %v3509_v40  ;;  %v3583_v24 = vld [vmem:[%s4818_s2 + $0x444] ss:$16 sps:$4 sm:$0xff]   ;;  %v3581_v26 = vld [vmem:[%s4818_s2 + $0x440] ss:$16 sps:$4 sm:$0xff]   ;;  %v3602_v40 = vld [vmem:[%s4818_s2 + $0x1e8] ss:$16 sps:$4 sm:$0xff]  }
  0x35   :  { %1310 = vmatprep.subr.bf16.mxu1 %v3511_v41  ;;  %v3589_v28 = vld [vmem:[%s4818_s2 + $0x424] ss:$16 sps:$4 sm:$0xff]   ;;  %v3587_v30 = vld [vmem:[%s4818_s2 + $0x420] ss:$16 sps:$4 sm:$0xff]  }
  0x36   :  { %v3595_v32 = vld [vmem:[%s4818_s2 + $0x404] ss:$16 sps:$4 sm:$0xff]   ;;  %v3593_v35 = vld [vmem:[%s4818_s2 + $0x400] ss:$16 sps:$4 sm:$0xff]  }
  0x37   :  { %1268 = vmatpush2.bf16.msra.mxu0 %v3513_v42  ;;  %v4402_v34 = vld [vmem:[%s4816_s0 + $0x14] ss:$24 sps:$4 sm:$0xff]   ;;  %v3599_v39 = vld [vmem:[%s4818_s2 + $0x5e0] ss:$16 sps:$4 sm:$0xff]  }
  0x38   :  { %1311 = vmatpush2.bf16.msra.mxu1 %v3514_v43  ;;  %1269 = vmatprep.subr.bf16.mxu0 %v3515_v44  ;;  %v3601_v37 = vld [vmem:[%s4818_s2 + $0x5e4] ss:$16 sps:$4 sm:$0xff]   ;;  %v3610_v42 = vld [vmem:[%s4818_s2 + $0x1cc] ss:$16 sps:$4 sm:$0xff]   ;;  %v3605_v43 = vld [vmem:[%s4818_s2 + $0x5c0] ss:$16 sps:$4 sm:$0xff]  }
  0x39   :  { %1312 = vmatprep.subr.bf16.mxu1 %v3517_v45  ;;  %v3607_v41 = vld [vmem:[%s4818_s2 + $0x5c4] ss:$16 sps:$4 sm:$0xff]   ;;  %v3608_v44 = vld [vmem:[%s4818_s2 + $0x1c8] ss:$16 sps:$4 sm:$0xff]  }
  0x3a   :  { %v3613_v45 = vld [vmem:[%s4818_s2 + $0x5a4] ss:$16 sps:$4 sm:$0xff]  }
  0x3b   :  { %1270 = vmatpush2.bf16.msra.mxu0 %v3519_v46  ;;  %v3616_v46 = vld [vmem:[%s4818_s2 + $0x1ac] ss:$16 sps:$4 sm:$0xff]  }
  0x3c   :  { %1313 = vmatpush2.bf16.msra.mxu1 %v3520_v47  ;;  %1271 = vmatprep.subr.bf16.mxu0 %v3521_v48  ;;  %v3611_v47 = vld [vmem:[%s4818_s2 + $0x5a0] ss:$16 sps:$4 sm:$0xff]   ;;  %v3614_v48 = vld [vmem:[%s4818_s2 + $0x1a8] ss:$16 sps:$4 sm:$0xff]  }
  0x3d   :  { %1314 = vmatprep.subr.bf16.mxu1 %v3523_v50  ;;  %v3622_v50 = vld [vmem:[%s4818_s2 + $0x18c] ss:$16 sps:$4 sm:$0xff]  }
  0x3f   :  { %1272 = vmatpush2.bf16.msra.mxu0 %v3525_v52  ;;  %v3617_v52 = vld [vmem:[%s4818_s2 + $0x580] ss:$16 sps:$4 sm:$0xff]  }
  0x40   :  { %1315 = vmatpush2.bf16.msra.mxu1 %v3526_v53  ;;  %1273 = vmatprep.subr.bf16.mxu0 %v3527_v54  ;;  %v3620_v53 = vld [vmem:[%s4818_s2 + $0x188] ss:$16 sps:$4 sm:$0xff]   ;;  %v3625_v54 = vld [vmem:[%s4818_s2 + $0x564] ss:$16 sps:$4 sm:$0xff]  }
  0x41   :  { %1316 = vmatprep.subr.bf16.mxu1 %v3529_v55  ;;  %v3628_v55 = vld [vmem:[%s4818_s2 + $0x16c] ss:$16 sps:$4 sm:$0xff]  }
  0x43   :  { %1274 = vmatpush2.bf16.msra.mxu0 %v3531_v56  ;;  %v3623_v56 = vld [vmem:[%s4818_s2 + $0x560] ss:$16 sps:$4 sm:$0xff]  }
  0x44   :  { %1317 = vmatpush2.bf16.msra.mxu1 %v3532_v57  ;;  %1275 = vmatprep.subr.bf16.mxu0 %v3533_v58  ;;  %v3626_v57 = vld [vmem:[%s4818_s2 + $0x168] ss:$16 sps:$4 sm:$0xff]   ;;  %v3631_v58 = vld [vmem:[%s4818_s2 + $0x544] ss:$16 sps:$4 sm:$0xff]  }
  0x45   :  { %1318 = vmatprep.subr.bf16.mxu1 %v3535_v59  ;;  %v3634_v59 = vld [vmem:[%s4818_s2 + $0x14c] ss:$16 sps:$4 sm:$0xff]  }
  0x47   :  { %1276 = vmatpush2.bf16.msra.mxu0 %v3537_v60  ;;  %v3629_v60 = vld [vmem:[%s4818_s2 + $0x540] ss:$16 sps:$4 sm:$0xff]  }
  0x48   :  { %1319 = vmatpush2.bf16.msra.mxu1 %v3538_v61  ;;  %1277 = vmatprep.subr.bf16.mxu0 %v3539_v62  ;;  %v3632_v61 = vld [vmem:[%s4818_s2 + $0x148] ss:$16 sps:$4 sm:$0xff]   ;;  %v3637_v62 = vld [vmem:[%s4818_s2 + $0x524] ss:$16 sps:$4 sm:$0xff]  }
  0x49   :  { %1320 = vmatprep.subr.bf16.mxu1 %v3541_v63  ;;  %v3640_v63 = vld [vmem:[%s4818_s2 + $0x12c] ss:$16 sps:$4 sm:$0xff]  }
  0x4b   :  { %1278 = vmatpush2.bf16.msra.mxu0 %v3543_v0  ;;  %v3635_v0 = vld [vmem:[%s4818_s2 + $0x520] ss:$16 sps:$4 sm:$0xff]  }
  0x4c   :  { %1321 = vmatpush2.bf16.msra.mxu1 %v3544_v1  ;;  %1333 = vmatprep.subr.bf16.mxu0 %v3553_v2  ;;  %v3638_v1 = vld [vmem:[%s4818_s2 + $0x128] ss:$16 sps:$4 sm:$0xff]   ;;  %v3643_v2 = vld [vmem:[%s4818_s2 + $0x504] ss:$16 sps:$4 sm:$0xff]  }
  0x4d   :  { %1376 = vmatprep.subr.bf16.mxu1 %v3556_v3  ;;  %v3646_v3 = vld [vmem:[%s4818_s2 + $0x10c] ss:$16 sps:$4 sm:$0xff]  }
  0x4e   :  { %1280 = vmatmul.mubr.bf16.vlgmr.msra.gmra.mxu0 %v4309_v4 }
  0x4f   :  { %1323 = vmatmul.mubr.bf16.vlgmr.msra.gmra.mxu1 %v3548_v5  ;;  %1334 = vmatpush1.bf16.msra.mxu0 %v3551_v6  ;;  %v3641_v5 = vld [vmem:[%s4818_s2 + $0x500] ss:$16 sps:$4 sm:$0xff]   ;;  %v3644_v6 = vld [vmem:[%s4818_s2 + $0x108] ss:$16 sps:$4 sm:$0xff]  }
  0x50   :  { %1377 = vmatpush1.bf16.msra.mxu1 %v3554_v7  ;;  %1335 = vmatprep.subr.bf16.mxu0 %v3559_v8  ;;  %v3652_v7 = vld [vmem:[%s4818_s2 + $0x2ec] ss:$16 sps:$4 sm:$0xff]  }
  0x51   :  { %1378 = vmatprep.subr.bf16.mxu1 %v3562_v9  ;;  %1408 = vmatprep.mubr.bf16.mxu1 %v3547_v49  ;;  %v3619_v49 = vld [vmem:[%s4818_s2 + $0x584] ss:$16 sps:$4 sm:$0xff]   ;;  %v3655_v8 = vld [vmem:[%s4818_s2 + $0x4ec] ss:$16 sps:$4 sm:$0xff]   ;;  %v4516_v9 = vld [vmem:[%s4816_s0 + $0x10] ss:$24 sps:$4 sm:$0xff]  }
  0x52   :  { %1365 = vmatprep.mubr.bf16.mxu0 %v4402_v34 }
  0x53   :  { %1336 = vmatpush1.bf16.msra.mxu0 %v3557_v10  ;;  %v3650_v10 = vld [vmem:[%s4818_s2 + $0x2e8] ss:$16 sps:$4 sm:$0xff]  }
  0x54   :  { %1379 = vmatpush1.bf16.msra.mxu1 %v3560_v11  ;;  %1337 = vmatprep.subr.bf16.mxu0 %v3565_v12  ;;  %v3653_v11 = vld [vmem:[%s4818_s2 + $0x4e8] ss:$16 sps:$4 sm:$0xff]   ;;  %v3658_v12 = vld [vmem:[%s4818_s2 + $0x2cc] ss:$16 sps:$4 sm:$0xff]  }
  0x55   :  { %1380 = vmatprep.subr.bf16.mxu1 %v3568_v13  ;;  %v3661_v13 = vld [vmem:[%s4818_s2 + $0x4cc] ss:$16 sps:$4 sm:$0xff]  }
  0x57   :  { %1338 = vmatpush1.bf16.msra.mxu0 %v3563_v14  ;;  %v3656_v14 = vld [vmem:[%s4818_s2 + $0x2c8] ss:$16 sps:$4 sm:$0xff]  }
  0x58   :  { %1381 = vmatpush1.bf16.msra.mxu1 %v3566_v15  ;;  %1339 = vmatprep.subr.bf16.mxu0 %v3571_v16  ;;  %v3659_v15 = vld [vmem:[%s4818_s2 + $0x4c8] ss:$16 sps:$4 sm:$0xff]   ;;  %v3664_v16 = vld [vmem:[%s4818_s2 + $0x2ac] ss:$16 sps:$4 sm:$0xff]  }
  0x59   :  { %1382 = vmatprep.subr.bf16.mxu1 %v3574_v17  ;;  %v3667_v17 = vld [vmem:[%s4818_s2 + $0x4ac] ss:$16 sps:$4 sm:$0xff]  }
  0x5b   :  { %1340 = vmatpush1.bf16.msra.mxu0 %v3569_v18  ;;  %v3665_v18 = vld [vmem:[%s4818_s2 + $0x4a8] ss:$16 sps:$4 sm:$0xff]  }
  0x5c   :  { %1383 = vmatpush1.bf16.msra.mxu1 %v3572_v19  ;;  %1341 = vmatprep.subr.bf16.mxu0 %v3577_v20  ;;  %v3670_v19 = vld [vmem:[%s4818_s2 + $0x28c] ss:$16 sps:$4 sm:$0xff]  }
  0x5d   :  { %1384 = vmatprep.subr.bf16.mxu1 %v3580_v21  ;;  %v3673_v20 = vld [vmem:[%s4818_s2 + $0x48c] ss:$16 sps:$4 sm:$0xff]   ;;  %v3671_v21 = vld [vmem:[%s4818_s2 + $0x488] ss:$16 sps:$4 sm:$0xff]  }
  0x5f   :  { %1342 = vmatpush1.bf16.msra.mxu0 %v3575_v22  ;;  %v3676_v22 = vld [vmem:[%s4818_s2 + $0x26c] ss:$16 sps:$4 sm:$0xff]  }
  0x60   :  { %1385 = vmatpush1.bf16.msra.mxu1 %v3578_v23  ;;  %1343 = vmatprep.subr.bf16.mxu0 %v3583_v24  ;;  %v3679_v23 = vld [vmem:[%s4818_s2 + $0x46c] ss:$16 sps:$4 sm:$0xff]   ;;  %v3674_v24 = vld [vmem:[%s4818_s2 + $0x268] ss:$16 sps:$4 sm:$0xff]  }
  0x61   :  { %1386 = vmatprep.subr.bf16.mxu1 %v3586_v25  ;;  %v3677_v25 = vld [vmem:[%s4818_s2 + $0x468] ss:$16 sps:$4 sm:$0xff]  }
  0x63   :  { %1344 = vmatpush1.bf16.msra.mxu0 %v3581_v26  ;;  %v3682_v26 = vld [vmem:[%s4818_s2 + $0x24c] ss:$16 sps:$4 sm:$0xff]  }
  0x64   :  { %1387 = vmatpush1.bf16.msra.mxu1 %v3584_v27  ;;  %1345 = vmatprep.subr.bf16.mxu0 %v3589_v28  ;;  %v3685_v27 = vld [vmem:[%s4818_s2 + $0x44c] ss:$16 sps:$4 sm:$0xff]   ;;  %v3680_v28 = vld [vmem:[%s4818_s2 + $0x248] ss:$16 sps:$4 sm:$0xff]  }
  0x65   :  { %1388 = vmatprep.subr.bf16.mxu1 %v3592_v29  ;;  %v3683_v29 = vld [vmem:[%s4818_s2 + $0x448] ss:$16 sps:$4 sm:$0xff]  }
  0x67   :  { %1346 = vmatpush1.bf16.msra.mxu0 %v3587_v30  ;;  %v3688_v30 = vld [vmem:[%s4818_s2 + $0x22c] ss:$16 sps:$4 sm:$0xff]  }
  0x68   :  { %1389 = vmatpush1.bf16.msra.mxu1 %v3590_v31  ;;  %1347 = vmatprep.subr.bf16.mxu0 %v3595_v32  ;;  %v3691_v31 = vld [vmem:[%s4818_s2 + $0x42c] ss:$16 sps:$4 sm:$0xff]   ;;  %v3686_v32 = vld [vmem:[%s4818_s2 + $0x228] ss:$16 sps:$4 sm:$0xff]  }
  0x69   :  { %1390 = vmatprep.subr.bf16.mxu1 %v3598_v33  ;;  %v3689_v33 = vld [vmem:[%s4818_s2 + $0x428] ss:$16 sps:$4 sm:$0xff]  }
  0x6b   :  { %1348 = vmatpush1.bf16.msra.mxu0 %v3593_v35  ;;  %v3697_v35 = vld [vmem:[%s4818_s2 + $0x40c] ss:$16 sps:$4 sm:$0xff]  }
  0x6c   :  { %1391 = vmatpush1.bf16.msra.mxu1 %v3596_v36  ;;  %1349 = vmatprep.subr.bf16.mxu0 %v3601_v37  ;;  %v3692_v36 = vld [vmem:[%s4818_s2 + $0x208] ss:$16 sps:$4 sm:$0xff]  }
  0x6d   :  { %1392 = vmatprep.subr.bf16.mxu1 %v3604_v38  ;;  %v3695_v37 = vld [vmem:[%s4818_s2 + $0x408] ss:$16 sps:$4 sm:$0xff]   ;;  %v3700_v38 = vld [vmem:[%s4818_s2 + $0x3ec] ss:$16 sps:$4 sm:$0xff]  }
  0x6f   :  { %1350 = vmatpush2.bf16.msra.mxu0 %v3599_v39  ;;  %v3703_v39 = vld [vmem:[%s4818_s2 + $0x5ec] ss:$16 sps:$4 sm:$0xff]  }
  0x70   :  { %1393 = vmatpush2.bf16.msra.mxu1 %v3602_v40  ;;  %1351 = vmatprep.subr.bf16.mxu0 %v3607_v41  ;;  %v3698_v40 = vld [vmem:[%s4818_s2 + $0x3e8] ss:$16 sps:$4 sm:$0xff]  }
  0x71   :  { %1394 = vmatprep.subr.bf16.mxu1 %v3610_v42  ;;  %v3701_v41 = vld [vmem:[%s4818_s2 + $0x5e8] ss:$16 sps:$4 sm:$0xff]   ;;  %v3706_v42 = vld [vmem:[%s4818_s2 + $0x3cc] ss:$16 sps:$4 sm:$0xff]  }
  0x73   :  { %1352 = vmatpush2.bf16.msra.mxu0 %v3605_v43  ;;  %v3709_v43 = vld [vmem:[%s4818_s2 + $0x5cc] ss:$16 sps:$4 sm:$0xff]  }
  0x74   :  { %1395 = vmatpush2.bf16.msra.mxu1 %v3608_v44  ;;  %1353 = vmatprep.subr.bf16.mxu0 %v3613_v45  ;;  %v3704_v44 = vld [vmem:[%s4818_s2 + $0x3c8] ss:$16 sps:$4 sm:$0xff]  }
  0x75   :  { %1396 = vmatprep.subr.bf16.mxu1 %v3616_v46  ;;  %v3707_v45 = vld [vmem:[%s4818_s2 + $0x5c8] ss:$16 sps:$4 sm:$0xff]   ;;  %v3712_v46 = vld [vmem:[%s4818_s2 + $0x3ac] ss:$16 sps:$4 sm:$0xff]  }
  0x77   :  { %1354 = vmatpush2.bf16.msra.mxu0 %v3611_v47  ;;  %v3715_v47 = vld [vmem:[%s4818_s2 + $0x5ac] ss:$16 sps:$4 sm:$0xff]  }
  0x78   :  { %1397 = vmatpush2.bf16.msra.mxu1 %v3614_v48  ;;  %1355 = vmatprep.subr.bf16.mxu0 %v3619_v49  ;;  %v3710_v48 = vld [vmem:[%s4818_s2 + $0x3a8] ss:$16 sps:$4 sm:$0xff]  }
  0x79   :  { %1398 = vmatprep.subr.bf16.mxu1 %v3622_v50  ;;  %v3713_v49 = vld [vmem:[%s4818_s2 + $0x5a8] ss:$16 sps:$4 sm:$0xff]   ;;  %v3718_v50 = vld [vmem:[%s4818_s2 + $0x38c] ss:$16 sps:$4 sm:$0xff]  }
  0x7b   :  { %1356 = vmatpush2.bf16.msra.mxu0 %v3617_v52  ;;  %v3721_v52 = vld [vmem:[%s4818_s2 + $0x58c] ss:$16 sps:$4 sm:$0xff]  }
  0x7c   :  { %1399 = vmatpush2.bf16.msra.mxu1 %v3620_v53  ;;  %1357 = vmatprep.subr.bf16.mxu0 %v3625_v54  ;;  %v3716_v53 = vld [vmem:[%s4818_s2 + $0x388] ss:$16 sps:$4 sm:$0xff]  }
  0x7d   :  { %1400 = vmatprep.subr.bf16.mxu1 %v3628_v55  ;;  %v3719_v54 = vld [vmem:[%s4818_s2 + $0x588] ss:$16 sps:$4 sm:$0xff]   ;;  %v3724_v55 = vld [vmem:[%s4818_s2 + $0x36c] ss:$16 sps:$4 sm:$0xff]  }
  0x7f   :  { %1358 = vmatpush2.bf16.msra.mxu0 %v3623_v56  ;;  %v3727_v56 = vld [vmem:[%s4818_s2 + $0x56c] ss:$16 sps:$4 sm:$0xff]  }
  0x80   :  { %1401 = vmatpush2.bf16.msra.mxu1 %v3626_v57  ;;  %1359 = vmatprep.subr.bf16.mxu0 %v3631_v58  ;;  %v3722_v57 = vld [vmem:[%s4818_s2 + $0x368] ss:$16 sps:$4 sm:$0xff]  }
  0x81   :  { %1402 = vmatprep.subr.bf16.mxu1 %v3634_v59  ;;  %v3725_v58 = vld [vmem:[%s4818_s2 + $0x568] ss:$16 sps:$4 sm:$0xff]   ;;  %v3730_v59 = vld [vmem:[%s4818_s2 + $0x34c] ss:$16 sps:$4 sm:$0xff]  }
  0x83   :  { %1360 = vmatpush2.bf16.msra.mxu0 %v3629_v60  ;;  %v3733_v60 = vld [vmem:[%s4818_s2 + $0x54c] ss:$16 sps:$4 sm:$0xff]  }
  0x84   :  { %1403 = vmatpush2.bf16.msra.mxu1 %v3632_v61  ;;  %1361 = vmatprep.subr.bf16.mxu0 %v3637_v62  ;;  %v3728_v61 = vld [vmem:[%s4818_s2 + $0x348] ss:$16 sps:$4 sm:$0xff]  }
  0x85   :  { %1404 = vmatprep.subr.bf16.mxu1 %v3640_v63  ;;  %v3731_v62 = vld [vmem:[%s4818_s2 + $0x548] ss:$16 sps:$4 sm:$0xff]   ;;  %v3736_v63 = vld [vmem:[%s4818_s2 + $0x32c] ss:$16 sps:$4 sm:$0xff]  }
  0x87   :  { %1362 = vmatpush2.bf16.msra.mxu0 %v3635_v0  ;;  %v3739_v0 = vld [vmem:[%s4818_s2 + $0x52c] ss:$16 sps:$4 sm:$0xff]  }
  0x88   :  { %1405 = vmatpush2.bf16.msra.mxu1 %v3638_v1  ;;  %1363 = vmatprep.subr.bf16.mxu0 %v3643_v2  ;;  %v3734_v1 = vld [vmem:[%s4818_s2 + $0x328] ss:$16 sps:$4 sm:$0xff]  }
  0x89   :  { %1406 = vmatprep.subr.bf16.mxu1 %v3646_v3  ;;  %v3737_v2 = vld [vmem:[%s4818_s2 + $0x528] ss:$16 sps:$4 sm:$0xff]   ;;  %v3742_v3 = vld [vmem:[%s4818_s2 + $0x30c] ss:$16 sps:$4 sm:$0xff]  }
  0x8b   :  { %1364 = vmatpush2.bf16.msra.mxu0 %v3641_v5  ;;  %v3745_v5 = vld [vmem:[%s4818_s2 + $0x50c] ss:$16 sps:$4 sm:$0xff]  }
  0x8c   :  { %1407 = vmatpush2.bf16.msra.mxu1 %v3644_v6  ;;  %1419 = vmatprep.subr.bf16.mxu0 %v3652_v7  ;;  %v3740_v6 = vld [vmem:[%s4818_s2 + $0x308] ss:$16 sps:$4 sm:$0xff]  }
  0x8d   :  { %1462 = vmatprep.subr.bf16.mxu1 %v3655_v8  ;;  %v3743_v7 = vld [vmem:[%s4818_s2 + $0x508] ss:$16 sps:$4 sm:$0xff]   ;;  %v3748_v8 = vld [vmem:[#allocation2 + $0x154] ss:$24 sps:$4 sm:$0xff]  }
  0x8e   :  { %1366 = vmatmul.mubr.bf16.vlgmr.msra.gmra.mxu0 %v4516_v9 }
  0x8f   :  { %1409 = vmatmul.mubr.bf16.vlgmr.msra.gmra.mxu1 %v4309_v4  ;;  %1420 = vmatpush1.bf16.msra.mxu0 %v3650_v10  ;;  %v3662_v4 = vld [vmem:[%s4818_s2 + $0x2a8] ss:$16 sps:$4 sm:$0xff]  }
  0x90   :  { %1463 = vmatpush1.bf16.msra.mxu1 %v3653_v11  ;;  %1421 = vmatprep.subr.bf16.mxu0 %v3658_v12  ;;  %v3746_v10 = vld [vmem:[#allocation2 + $0x150] ss:$24 sps:$4 sm:$0xff]   ;;  %v3751_v11 = vld [vmem:[#allocation2 + $0x124] ss:$24 sps:$4 sm:$0xff]   ;;  %v3749_v12 = vld [vmem:[#allocation2 + $0x120] ss:$24 sps:$4 sm:$0xff]  }
  0x91   :  { %1464 = vmatprep.subr.bf16.mxu1 %v3661_v13  ;;  %1451 = vmatprep.mubr.bf16.mxu0 %v4255_v51  ;;  %v3668_v51 = vld [vmem:[%s4818_s2 + $0x288] ss:$16 sps:$4 sm:$0xff]  }
  0x92   :  { %1494 = vmatprep.mubr.bf16.mxu1 %v4402_v34  ;;  %v3694_v34 = vld [vmem:[%s4818_s2 + $0x20c] ss:$16 sps:$4 sm:$0xff]   ;;  %v4034_v13 = vld [vmem:[%s4816_s0 + $0x8] ss:$24 sps:$4 sm:$0xff]  }
  0x93   :  { %1422 = vmatpush1.bf16.msra.mxu0 %v3656_v14  ;;  %v3754_v14 = vld [vmem:[#allocation2 + $0xf4] ss:$24 sps:$4 sm:$0xff]  }
  0x94   :  { %1465 = vmatpush1.bf16.msra.mxu1 %v3659_v15  ;;  %1423 = vmatprep.subr.bf16.mxu0 %v3664_v16  ;;  %v3752_v15 = vld [vmem:[#allocation2 + $0xf0] ss:$24 sps:$4 sm:$0xff]   ;;  %v3757_v16 = vld [vmem:[#allocation2 + $0xc4] ss:$24 sps:$4 sm:$0xff]  }
  0x95   :  { %1466 = vmatprep.subr.bf16.mxu1 %v3667_v17  ;;  %v3755_v17 = vld [vmem:[#allocation2 + $0xc0] ss:$24 sps:$4 sm:$0xff]  }
  0x97   :  { %1424 = vmatpush1.bf16.msra.mxu0 %v3662_v4  ;;  %v3760_v4 = vld [vmem:[#allocation2 + $0x94] ss:$24 sps:$4 sm:$0xff]  }
  0x98   :  { %1467 = vmatpush1.bf16.msra.mxu1 %v3665_v18  ;;  %1425 = vmatprep.subr.bf16.mxu0 %v3670_v19  ;;  %v3758_v18 = vld [vmem:[#allocation2 + $0x90] ss:$24 sps:$4 sm:$0xff]   ;;  %v3763_v19 = vld [vmem:[#allocation2 + $0x64] ss:$24 sps:$4 sm:$0xff]  }
  0x99   :  { %1468 = vmatprep.subr.bf16.mxu1 %v3673_v20  ;;  %v3799_v20 = vld [vmem:[#allocation2 + $0x454] ss:$24 sps:$4 sm:$0xff]  }
  0x9b   :  { %1426 = vmatpush1.bf16.msra.mxu0 %v3668_v51  ;;  %v3797_v51 = vld [vmem:[#allocation2 + $0x450] ss:$24 sps:$4 sm:$0xff]  }
  0x9c   :  { %1469 = vmatpush1.bf16.msra.mxu1 %v3671_v21  ;;  %1427 = vmatprep.subr.bf16.mxu0 %v3676_v22  ;;  %v3766_v21 = vld [vmem:[#allocation2 + $0x34] ss:$24 sps:$4 sm:$0xff]   ;;  %v3805_v22 = vld [vmem:[#allocation2 + $0x424] ss:$24 sps:$4 sm:$0xff]  }
  0x9d   :  { %1470 = vmatprep.subr.bf16.mxu1 %v3679_v23  ;;  %v3803_v23 = vld [vmem:[#allocation2 + $0x420] ss:$24 sps:$4 sm:$0xff]  }
  0x9f   :  { %1428 = vmatpush1.bf16.msra.mxu0 %v3674_v24  ;;  %v3764_v24 = vld [vmem:[#allocation2 + $0x30] ss:$24 sps:$4 sm:$0xff]  }
  0xa0   :  { %1471 = vmatpush1.bf16.msra.mxu1 %v3677_v25  ;;  %1429 = vmatprep.subr.bf16.mxu0 %v3682_v26  ;;  %v3769_v25 = vld [vmem:[#allocation2 + $0x4] ss:$24 sps:$4 sm:$0xff]   ;;  %v3811_v26 = vld [vmem:[#allocation2 + $0x3f4] ss:$24 sps:$4 sm:$0xff]  }
  0xa1   :  { %1472 = vmatprep.subr.bf16.mxu1 %v3685_v27  ;;  %v3809_v27 = vld [vmem:[#allocation2 + $0x3f0] ss:$24 sps:$4 sm:$0xff]  }
  0xa3   :  { %1430 = vmatpush1.bf16.msra.mxu0 %v3680_v28  ;;  %v3767_v28 = vld [vmem:[#allocation2] ss:$24 sps:$4 sm:$0xff]  }
  0xa4   :  { %1473 = vmatpush1.bf16.msra.mxu1 %v3683_v29  ;;  %1431 = vmatprep.subr.bf16.mxu0 %v3688_v30  ;;  %v3772_v29 = vld [vmem:[#allocation2 + $0x2d4] ss:$24 sps:$4 sm:$0xff]   ;;  %v3817_v30 = vld [vmem:[#allocation2 + $0x3c4] ss:$24 sps:$4 sm:$0xff]  }
  0xa5   :  { %1474 = vmatprep.subr.bf16.mxu1 %v3691_v31  ;;  %v3815_v31 = vld [vmem:[#allocation2 + $0x3c0] ss:$24 sps:$4 sm:$0xff]  }
  0xa7   :  { %1432 = vmatpush1.bf16.msra.mxu0 %v3686_v32  ;;  %v3770_v32 = vld [vmem:[#allocation2 + $0x2d0] ss:$24 sps:$4 sm:$0xff]  }
  0xa8   :  { %1475 = vmatpush1.bf16.msra.mxu1 %v3689_v33  ;;  %1433 = vmatprep.subr.bf16.mxu0 %v3694_v34  ;;  %v3775_v33 = vld [vmem:[#allocation2 + $0x2a4] ss:$24 sps:$4 sm:$0xff]   ;;  %v3823_v34 = vld [vmem:[#allocation2 + $0x394] ss:$24 sps:$4 sm:$0xff]  }
  0xa9   :  { %1476 = vmatprep.subr.bf16.mxu1 %v3697_v35  ;;  %v3821_v35 = vld [vmem:[#allocation2 + $0x390] ss:$24 sps:$4 sm:$0xff]  }
  0xab   :  { %1434 = vmatpush1.bf16.msra.mxu0 %v3692_v36  ;;  %v3773_v36 = vld [vmem:[#allocation2 + $0x2a0] ss:$24 sps:$4 sm:$0xff]  }
  0xac   :  { %1477 = vmatpush1.bf16.msra.mxu1 %v3695_v37  ;;  %1435 = vmatprep.subr.bf16.mxu0 %v3700_v38  ;;  %v3778_v37 = vld [vmem:[#allocation2 + $0x274] ss:$24 sps:$4 sm:$0xff]   ;;  %v3829_v38 = vld [vmem:[#allocation2 + $0x364] ss:$24 sps:$4 sm:$0xff]  }
  0xad   :  { %1478 = vmatprep.subr.bf16.mxu1 %v3703_v39  ;;  %v3827_v39 = vld [vmem:[#allocation2 + $0x360] ss:$24 sps:$4 sm:$0xff]  }
  0xaf   :  { %1436 = vmatpush2.bf16.msra.mxu0 %v3698_v40  ;;  %v3776_v40 = vld [vmem:[#allocation2 + $0x270] ss:$24 sps:$4 sm:$0xff]  }
  0xb0   :  { %1479 = vmatpush2.bf16.msra.mxu1 %v3701_v41  ;;  %1437 = vmatprep.subr.bf16.mxu0 %v3706_v42  ;;  %v3781_v41 = vld [vmem:[#allocation2 + $0x244] ss:$24 sps:$4 sm:$0xff]   ;;  %v3835_v42 = vld [vmem:[#allocation2 + $0x334] ss:$24 sps:$4 sm:$0xff]  }
  0xb1   :  { %1480 = vmatprep.subr.bf16.mxu1 %v3709_v43  ;;  %v3833_v43 = vld [vmem:[#allocation2 + $0x330] ss:$24 sps:$4 sm:$0xff]  }
  0xb3   :  { %1438 = vmatpush2.bf16.msra.mxu0 %v3704_v44  ;;  %v3779_v44 = vld [vmem:[#allocation2 + $0x240] ss:$24 sps:$4 sm:$0xff]  }
  0xb4   :  { %1481 = vmatpush2.bf16.msra.mxu1 %v3707_v45  ;;  %1439 = vmatprep.subr.bf16.mxu0 %v3712_v46  ;;  %v3784_v45 = vld [vmem:[#allocation2 + $0x214] ss:$24 sps:$4 sm:$0xff]   ;;  %v3841_v46 = vld [vmem:[#allocation2 + $0x304] ss:$24 sps:$4 sm:$0xff]  }
  0xb5   :  { %1482 = vmatprep.subr.bf16.mxu1 %v3715_v47  ;;  %v3839_v47 = vld [vmem:[#allocation2 + $0x300] ss:$24 sps:$4 sm:$0xff]  }
  0xb7   :  { %1440 = vmatpush2.bf16.msra.mxu0 %v3710_v48  ;;  %v3782_v48 = vld [vmem:[#allocation2 + $0x210] ss:$24 sps:$4 sm:$0xff]  }
  0xb8   :  { %1483 = vmatpush2.bf16.msra.mxu1 %v3713_v49  ;;  %1441 = vmatprep.subr.bf16.mxu0 %v3718_v50  ;;  %v3787_v49 = vld [vmem:[#allocation2 + $0x1e4] ss:$24 sps:$4 sm:$0xff]   ;;  %v3847_v50 = vld [vmem:[#allocation2 + $0x5d4] ss:$24 sps:$4 sm:$0xff]  }
  0xb9   :  { %1484 = vmatprep.subr.bf16.mxu1 %v3721_v52  ;;  %v3845_v52 = vld [vmem:[#allocation2 + $0x5d0] ss:$24 sps:$4 sm:$0xff]  }
  0xbb   :  { %1442 = vmatpush2.bf16.msra.mxu0 %v3716_v53  ;;  %v3785_v53 = vld [vmem:[#allocation2 + $0x1e0] ss:$24 sps:$4 sm:$0xff]  }
  0xbc   :  { %1485 = vmatpush2.bf16.msra.mxu1 %v3719_v54  ;;  %1443 = vmatprep.subr.bf16.mxu0 %v3724_v55  ;;  %v3790_v54 = vld [vmem:[#allocation2 + $0x1b4] ss:$24 sps:$4 sm:$0xff]   ;;  %v3853_v55 = vld [vmem:[#allocation2 + $0x5a4] ss:$24 sps:$4 sm:$0xff]  }
  0xbd   :  { %1486 = vmatprep.subr.bf16.mxu1 %v3727_v56  ;;  %v3851_v56 = vld [vmem:[#allocation2 + $0x5a0] ss:$24 sps:$4 sm:$0xff]  }
  0xbf   :  { %1444 = vmatpush2.bf16.msra.mxu0 %v3722_v57  ;;  %v3788_v57 = vld [vmem:[#allocation2 + $0x1b0] ss:$24 sps:$4 sm:$0xff]  }
  0xc0   :  { %1487 = vmatpush2.bf16.msra.mxu1 %v3725_v58  ;;  %1445 = vmatprep.subr.bf16.mxu0 %v3730_v59  ;;  %v3793_v58 = vld [vmem:[#allocation2 + $0x184] ss:$24 sps:$4 sm:$0xff]   ;;  %v3859_v59 = vld [vmem:[#allocation2 + $0x574] ss:$24 sps:$4 sm:$0xff]  }
  0xc1   :  { %1488 = vmatprep.subr.bf16.mxu1 %v3733_v60  ;;  %v3857_v60 = vld [vmem:[#allocation2 + $0x570] ss:$24 sps:$4 sm:$0xff]  }
  0xc3   :  { %1446 = vmatpush2.bf16.msra.mxu0 %v3728_v61  ;;  %v3791_v61 = vld [vmem:[#allocation2 + $0x180] ss:$24 sps:$4 sm:$0xff]  }
  0xc4   :  { %1489 = vmatpush2.bf16.msra.mxu1 %v3731_v62  ;;  %1447 = vmatprep.subr.bf16.mxu0 %v3736_v63  ;;  %v3796_v62 = vld [vmem:[#allocation2 + $0x15c] ss:$24 sps:$4 sm:$0xff]  }
  0xc5   :  { %1490 = vmatprep.subr.bf16.mxu1 %v3739_v0  ;;  %v3865_v63 = vld [vmem:[#allocation2 + $0x544] ss:$24 sps:$4 sm:$0xff]   ;;  %v3863_v0 = vld [vmem:[#allocation2 + $0x540] ss:$24 sps:$4 sm:$0xff]  }
  0xc7   :  { %1448 = vmatpush2.bf16.msra.mxu0 %v3734_v1  ;;  %v3871_v1 = vld [vmem:[#allocation2 + $0x514] ss:$24 sps:$4 sm:$0xff]  }
  0xc8   :  { %1491 = vmatpush2.bf16.msra.mxu1 %v3737_v2  ;;  %1449 = vmatprep.subr.bf16.mxu0 %v3742_v3  ;;  %v3869_v2 = vld [vmem:[#allocation2 + $0x510] ss:$24 sps:$4 sm:$0xff]   ;;  %v3877_v3 = vld [vmem:[#allocation2 + $0x4e4] ss:$24 sps:$4 sm:$0xff]  }
  0xc9   :  { %1492 = vmatprep.subr.bf16.mxu1 %v3745_v5  ;;  %v3875_v5 = vld [vmem:[#allocation2 + $0x4e0] ss:$24 sps:$4 sm:$0xff]  }
  0xcb   :  { %1450 = vmatpush2.bf16.msra.mxu0 %v3740_v6  ;;  %v3883_v6 = vld [vmem:[#allocation2 + $0x4b4] ss:$24 sps:$4 sm:$0xff]  }
  0xcc   :  { %1493 = vmatpush2.bf16.msra.mxu1 %v3743_v7  ;;  %2701 = vmatprep.subr.bf16.mxu0 %v3748_v8  ;;  %v3881_v7 = vld [vmem:[#allocation2 + $0x4b0] ss:$24 sps:$4 sm:$0xff]   ;;  %v3889_v8 = vld [vmem:[#allocation2 + $0x484] ss:$24 sps:$4 sm:$0xff]  }
  0xcd   :  { %2744 = vmatprep.subr.bf16.mxu1 %v3799_v20 }
  0xce   :  { %1452 = vmatmul.mubr.bf16.vlgmr.msra.gmra.mxu0 %v4034_v13 }
  0xcf   :  { %1495 = vmatmul.mubr.bf16.vlgmr.msra.gmra.mxu1 %v4516_v9  ;;  %2702 = vmatpush1.bf16.msra.mxu0 %v3746_v10  ;;  %v3761_v9 = vld [vmem:[#allocation2 + $0x60] ss:$24 sps:$4 sm:$0xff]  }
  0xd0   :  { %2703 = vmatprep.subr.bf16.mxu0 %v3751_v11  ;;  %2745 = vmatpush1.bf16.msra.mxu1 %v3797_v51  ;;  %v3887_v10 = vld [vmem:[#allocation2 + $0x480] ss:$24 sps:$4 sm:$0xff]   ;;  %v3895_v11 = vld [vmem:[#allocation2 + $0x45c] ss:$24 sps:$4 sm:$0xff]  }
  0xd1   :  { %2746 = vmatprep.subr.bf16.mxu1 %v3805_v22 }
  0xd3   :  { %2704 = vmatpush1.bf16.msra.mxu0 %v3749_v12  ;;  %v237_v12 = vlaneseq }
  0xd4   :  { %2705 = vmatprep.subr.bf16.mxu0 %v3754_v14  ;;  %2747 = vmatpush1.bf16.msra.mxu1 %v3803_v23 }
  0xd5   :  { %2748 = vmatprep.subr.bf16.mxu1 %v3811_v26  ;;  %v4712_v14 = vshrl.u32 %v237_v12, 7  ;;  %v3860_v12 = vld [vmem:[#allocation2 + $0x248] ss:$24 sps:$4 sm:$0xff]  }
  0xd7   :  { %2706 = vmatpush1.bf16.msra.mxu0 %v3752_v15 }
  0xd8   :  { %2707 = vmatprep.subr.bf16.mxu0 %v3757_v16  ;;  %2749 = vmatpush1.bf16.msra.mxu1 %v3809_v27  ;;  %v243_v16 = vsub.s32 1, %v4712_v14 }
  0xd9   :  { %2750 = vmatprep.subr.bf16.mxu1 %v3817_v30 }
  0xdb   :  { %2708 = vmatpush1.bf16.msra.mxu0 %v3755_v17  ;;  %v4718_v17 = vld [vmem:[%s4819_s3] sm:$0xf] }
  0xdc   :  { %2709 = vmatprep.subr.bf16.mxu0 %v3760_v4  ;;  %2751 = vmatpush1.bf16.msra.mxu1 %v3815_v31  ;;  %v239_v4 = vsub.s32 0, %v4712_v14  ;;  %v244_v20 = vrot.slane %v4718_v17, %v243_v16 }
  0xdd   :  { %2752 = vmatprep.subr.bf16.mxu1 %v3823_v34 }
  0xde   :  { %v240_v51 = vrot.slane %v4718_v17, %v239_v4 }
  0xdf   :  { %2710 = vmatpush1.bf16.msra.mxu0 %v3758_v18 }
  0xe0   :  { %2711 = vmatprep.subr.bf16.mxu0 %v3763_v19  ;;  %2753 = vmatpush1.bf16.msra.mxu1 %v3821_v35 }
  0xe1   :  { %2754 = vmatprep.subr.bf16.mxu1 %v3829_v38 }
  0xe3   :  { %2712 = vmatpush1.bf16.msra.mxu0 %v3761_v9 }
  0xe4   :  { %2713 = vmatprep.subr.bf16.mxu0 %v3766_v21  ;;  %2755 = vmatpush1.bf16.msra.mxu1 %v3827_v39 }
  0xe5   :  { %2756 = vmatprep.subr.bf16.mxu1 %v3835_v42 }
  0xe7   :  { %2714 = vmatpush1.bf16.msra.mxu0 %v3764_v24 }
  0xe8   :  { %2715 = vmatprep.subr.bf16.mxu0 %v3769_v25  ;;  %2757 = vmatpush1.bf16.msra.mxu1 %v3833_v43 }
  0xe9   :  { %2758 = vmatprep.subr.bf16.mxu1 %v3841_v46 }
  0xeb   :  { %2716 = vmatpush1.bf16.msra.mxu0 %v3767_v28 }
  0xec   :  { %2717 = vmatprep.subr.bf16.mxu0 %v3772_v29  ;;  %2759 = vmatpush1.bf16.msra.mxu1 %v3839_v47  ;;  %v3802_v47 = vld [vmem:[#allocation2 + $0x12c] ss:$24 sps:$4 sm:$0xff]  }
  0xed   :  { %2760 = vmatprep.subr.bf16.mxu1 %v3847_v50  ;;  %v3806_v50 = vld [vmem:[#allocation2 + $0xf8] ss:$24 sps:$4 sm:$0xff]  }
  0xef   :  { %2718 = vmatpush2.bf16.msra.mxu0 %v3770_v32 }
  0xf0   :  { %2719 = vmatprep.subr.bf16.mxu0 %v3775_v33  ;;  %2761 = vmatpush2.bf16.msra.mxu1 %v3845_v52  ;;  %v3814_v52 = vld [vmem:[#allocation2 + $0xcc] ss:$24 sps:$4 sm:$0xff]  }
  0xf1   :  { %2762 = vmatprep.subr.bf16.mxu1 %v3853_v55  ;;  %v4060_v55 = vmov 0  }
  0xf2   :  { %3448 = vset.pattern.permute.xlu0 %v4060_v55  ;;  %v3898_v55 = vld [vmem:[#allocation2 + $0x134] ss:$24 sps:$4 sm:$0xff]  }
  0xf3   :  { %2720 = vmatpush2.bf16.msra.mxu0 %v3773_v36 }
  0xf4   :  { %2721 = vmatprep.subr.bf16.mxu0 %v3778_v37  ;;  %2763 = vmatpush2.bf16.msra.mxu1 %v3851_v56  ;;  %v2971_v56 = vld [vmem:[%s4817_s1] sm:$0xff] }
  0xf5   :  { %2764 = vmatprep.subr.bf16.mxu1 %v3859_v59  ;;  %2975 = vperm.xlu0 %3448, %v2971_v56   ;;  %v2972_v59 = vld [vmem:[%s4817_s1 + $0x8] sm:$0xff] }
  0xf7   :  { %2722 = vmatpush2.bf16.msra.mxu0 %v3776_v40 }
  0xf8   :  { %2723 = vmatprep.subr.bf16.mxu0 %v3781_v41  ;;  %2765 = vmatpush2.bf16.msra.mxu1 %v3857_v60  ;;  %v3824_v60 = vld [vmem:[#allocation2 + $0x68] ss:$24 sps:$4 sm:$0xff]  }
  0xf9   :  { %2766 = vmatprep.subr.bf16.mxu1 %v3865_v63  ;;  %2980 = vperm.xlu0 %3448, %v2972_v59   ;;  %v3838_v63 = vld [vmem:[#allocation2 + $0xc] ss:$24 sps:$4 sm:$0xff]  }
  0xfb   :  { %2724 = vmatpush2.bf16.msra.mxu0 %v3779_v44 }
  0xfc   :  { %2725 = vmatprep.subr.bf16.mxu0 %v3784_v45  ;;  %2767 = vmatpush2.bf16.msra.mxu1 %v3863_v0  ;;  %v3794_v45 = vld [vmem:[#allocation2 + $0x158] ss:$24 sps:$4 sm:$0xff]   ;;  %v3836_v0 = vld [vmem:[#allocation2 + $0x8] ss:$24 sps:$4 sm:$0xff]  }
  0xfd   :  { %2768 = vmatprep.subr.bf16.mxu1 %v3871_v1  ;;  %v3844_v1 = vld [vmem:[#allocation2 + $0x2dc] ss:$24 sps:$4 sm:$0xff]  }
  0xff   :  { %2726 = vmatpush2.bf16.msra.mxu0 %v3782_v48  ;;  %v3800_v48 = vld [vmem:[#allocation2 + $0x128] ss:$24 sps:$4 sm:$0xff]  }
 0x100   :  { %2727 = vmatprep.subr.bf16.mxu0 %v3787_v49  ;;  %2769 = vmatpush2.bf16.msra.mxu1 %v3869_v2  ;;  %v3808_v49 = vld [vmem:[#allocation2 + $0xfc] ss:$24 sps:$4 sm:$0xff]   ;;  %v3842_v2 = vld [vmem:[#allocation2 + $0x2d8] ss:$24 sps:$4 sm:$0xff]  }
 0x101   :  { %2770 = vmatprep.subr.bf16.mxu1 %v3877_v3  ;;  %v3850_v3 = vld [vmem:[#allocation2 + $0x2ac] ss:$24 sps:$4 sm:$0xff]  }
 0x103   :  { %2728 = vmatpush2.bf16.msra.mxu0 %v3785_v53  ;;  %v3812_v53 = vld [vmem:[#allocation2 + $0xc8] ss:$24 sps:$4 sm:$0xff]  }
 0x104   :  { %2729 = vmatprep.subr.bf16.mxu0 %v3790_v54  ;;  %2771 = vmatpush2.bf16.msra.mxu1 %v3875_v5  ;;  %v3820_v54 = vld [vmem:[#allocation2 + $0x9c] ss:$24 sps:$4 sm:$0xff]   ;;  %v3848_v5 = vld [vmem:[#allocation2 + $0x2a8] ss:$24 sps:$4 sm:$0xff]  }
 0x105   :  { %2772 = vmatprep.subr.bf16.mxu1 %v3883_v6  ;;  %v3856_v6 = vld [vmem:[#allocation2 + $0x27c] ss:$24 sps:$4 sm:$0xff]  }
 0x107   :  { %2730 = vmatpush2.bf16.msra.mxu0 %v3788_v57  ;;  %v3818_v57 = vld [vmem:[#allocation2 + $0x98] ss:$24 sps:$4 sm:$0xff]  }
 0x108   :  { %2731 = vmatprep.subr.bf16.mxu0 %v3793_v58  ;;  %2773 = vmatpush2.bf16.msra.mxu1 %v3881_v7  ;;  %v3826_v58 = vld [vmem:[#allocation2 + $0x6c] ss:$24 sps:$4 sm:$0xff]  }
 0x109   :  { %2774 = vmatprep.subr.bf16.mxu1 %v3889_v8  ;;  %v3854_v8 = vld [vmem:[#allocation2 + $0x278] ss:$24 sps:$4 sm:$0xff]  }
 0x10b   :  { %2732 = vmatpush2.bf16.msra.mxu0 %v3791_v61  ;;  %v3832_v61 = vld [vmem:[#allocation2 + $0x3c] ss:$24 sps:$4 sm:$0xff]  }
 0x10c   :  { %2787 = vmatprep.subr.bf16.mxu0 %v3796_v62  ;;  %2775 = vmatpush2.bf16.msra.mxu1 %v3887_v10  ;;  %v3830_v62 = vld [vmem:[#allocation2 + $0x38] ss:$24 sps:$4 sm:$0xff]   ;;  %v3862_v10 = vld [vmem:[#allocation2 + $0x24c] ss:$24 sps:$4 sm:$0xff]  }
 0x10d   :  { %2830 = vmatprep.subr.bf16.mxu1 %v3895_v11 }
 0x10e   :  { %v1281_v13 = vpop.f32.mrf.mxu0 }
 0x10f   :  { %v1324_v18 = vpop.f32.mrf.mxu1  ;;  %v1282_v24 = vadd.f32 %v1281_v13, %v240_v51  ;;  %v3868_v13 = vld [vmem:[#allocation2 + $0x21c] ss:$24 sps:$4 sm:$0xff]  }
 0x110   :  { %v1283_v15 = vpop.f32.mrf.mxu0 }
 0x111   :  { %v1326_v9 = vpop.f32.mrf.mxu1  ;;  %v1284_v22 = vadd.f32 %v1283_v15, %v244_v20  ;;  %v1325_v31 = vadd.f32 %v1324_v18, %v1282_v24  ;;  %v251_v15 = vsub.s32 3, %v4712_v14 }
 0x112   :  { %v1285_v19 = vpop.f32.mrf.mxu0 }
 0x113   :  { %v1286_v23 = vadd.f32 %v1285_v19, %v240_v51  ;;  %v1328_v25 = vpop.f32.mrf.mxu1  ;;  %v1327_v29 = vadd.f32 %v1326_v9, %v1284_v22  ;;  %v247_v19 = vsub.s32 2, %v4712_v14  ;;  %v3874_v51 = vld [vmem:[#allocation2 + $0x1ec] ss:$24 sps:$4 sm:$0xff]   ;;  %v252_v9 = vrot.slane %v4718_v17, %v251_v15 }
 0x114   :  { %v1287_v21 = vpop.f32.mrf.mxu0 }
 0x115   :  { %v1288_v27 = vadd.f32 %v1287_v21, %v244_v20  ;;  %v1329_v30 = vadd.f32 %v1328_v25, %v1286_v23  ;;  %v1330_v32 = vpop.f32.mrf.mxu1  ;;  %v3866_v20 = vld [vmem:[#allocation2 + $0x218] ss:$24 sps:$4 sm:$0xff]   ;;  %v248_v22 = vrot.slane %v4718_v17, %v247_v19  ;;  %v3872_v23 = vld [vmem:[#allocation2 + $0x1e8] ss:$24 sps:$4 sm:$0xff]  }
 0x117   :  { %v1331_v34 = vadd.f32 %v1330_v32, %v1288_v27 }
 0x14e   :  { %v1367_v26 = vpop.f32.mrf.mxu0 }
 0x14f   :  { %v1368_v37 = vadd.f32 %v1367_v26, %v1325_v31  ;;  %v1410_v7 = vpop.f32.mrf.mxu1  ;;  %v3880_v26 = vld [vmem:[#allocation2 + $0x1bc] ss:$24 sps:$4 sm:$0xff]  }
 0x150   :  { %v1369_v28 = vpop.f32.mrf.mxu0 }
 0x151   :  { %v1370_v35 = vadd.f32 %v1369_v28, %v1327_v29  ;;  %v1505_v43 = vmax.f32 %v1368_v37, 0.0  ;;  %v1412_v11 = vpop.f32.mrf.mxu1 }
 0x152   :  { %v1371_v33 = vpop.f32.mrf.mxu0  ;;  %v1413_v27 = vadd.f32 %v1412_v11, %v252_v9  ;;  %v3922_v11 = vld [vmem:[#allocation2 + $0x74] ss:$24 sps:$4 sm:$0xff]  }
 0x153   :  { %v1372_v36 = vadd.f32 %v1371_v33, %v1329_v30  ;;  %v1506_v41 = vmax.f32 %v1370_v35, 0.0  ;;  %v1414_v18 = vpop.f32.mrf.mxu1  ;;  %v1411_v30 = vadd.f32 %v1410_v7, %v248_v22  ;;  %v3878_v33 = vld [vmem:[#allocation2 + $0x1b8] ss:$24 sps:$4 sm:$0xff]   ;;  %v3911_v7 = vld [vmem:[#allocation2 + $0x3c8] ss:$24 sps:$4 sm:$0xff]  }
 0x154   :  { %v1373_v38 = vpop.f32.mrf.mxu0  ;;  %v1415_v31 = vadd.f32 %v1414_v18, %v248_v22  ;;  %v3925_v18 = vld [vmem:[#allocation2 + $0x36c] ss:$24 sps:$4 sm:$0xff]  }
 0x155   :  { %v1374_v39 = vadd.f32 %v1373_v38, %v1331_v34  ;;  %v1509_v40 = vmax.f32 %v1372_v36, 0.0  ;;  %v1416_v21 = vpop.f32.mrf.mxu1  ;;  %v3886_v36 = vld [vmem:[#allocation2 + $0x18c] ss:$24 sps:$4 sm:$0xff]  }
 0x156   :  { %v1417_v37 = vadd.f32 %v1416_v21, %v252_v9  ;;  %v3926_v9 = vld [vmem:[#allocation2 + $0x40] ss:$24 sps:$4 sm:$0xff]   ;;  %v3931_v21 = vld [vmem:[#allocation2 + $0x33c] ss:$24 sps:$4 sm:$0xff]  }
 0x157   :  { %v1510_v42 = vmax.f32 %v1374_v39, 0.0  ;;  %v4729_v46 = vpack.c.bf16 %v1509_v40, %v1505_v43  ;;  %v3884_v43 = vld [vmem:[#allocation2 + $0x188] ss:$24 sps:$4 sm:$0xff]   ;;  %v3934_v22 = vld [vmem:[#allocation2 + $0x14] ss:$24 sps:$4 sm:$0xff]  }
 0x159   :  { %v4727_v44 = vpack.c.bf16 %v1510_v42, %v1506_v41 }
 0x15b   :  { %2733 = vmatprep.mubr.bf16.mxu0 %v4727_v44 }
 0x15c   :  { %2734 = vmatmul.mubr.bf16.vlgmr.msra.gmra.mxu0 %v4729_v46 }
 0x15d   :  { %2788 = vmatpush1.bf16.msra.mxu0 %v3794_v45  ;;  %2819 = vmatprep.mubr.bf16.mxu0 %v4727_v44 }
 0x15e   :  { %2789 = vmatprep.subr.bf16.mxu0 %v3802_v47  ;;  %v3892_v47 = vld [vmem:[#allocation2 + $0x164] ss:$24 sps:$4 sm:$0xff]  }
 0x161   :  { %2790 = vmatpush1.bf16.msra.mxu0 %v3800_v48 }
 0x162   :  { %2791 = vmatprep.subr.bf16.mxu0 %v3808_v49 }
 0x165   :  { %2792 = vmatpush1.bf16.msra.mxu0 %v3806_v50 }
 0x166   :  { %2793 = vmatprep.subr.bf16.mxu0 %v3814_v52 }
 0x169   :  { %2794 = vmatpush1.bf16.msra.mxu0 %v3812_v53 }
 0x16a   :  { %2795 = vmatprep.subr.bf16.mxu0 %v3820_v54  ;;  %v3890_v54 = vld [vmem:[#allocation2 + $0x160] ss:$24 sps:$4 sm:$0xff]  }
 0x16d   :  { %2796 = vmatpush1.bf16.msra.mxu0 %v3818_v57 }
 0x16e   :  { %2797 = vmatprep.subr.bf16.mxu0 %v3826_v58  ;;  %v3893_v58 = vld [vmem:[#allocation2 + $0x458] ss:$24 sps:$4 sm:$0xff]  }
 0x171   :  { %2798 = vmatpush1.bf16.msra.mxu0 %v3824_v60  ;;  %v3896_v60 = vld [vmem:[#allocation2 + $0x130] ss:$24 sps:$4 sm:$0xff]  }
 0x172   :  { %2799 = vmatprep.subr.bf16.mxu0 %v3832_v61  ;;  %v3901_v61 = vld [vmem:[#allocation2 + $0x42c] ss:$24 sps:$4 sm:$0xff]  }
 0x175   :  { %2800 = vmatpush1.bf16.msra.mxu0 %v3830_v62  ;;  %v3904_v62 = vld [vmem:[#allocation2 + $0x104] ss:$24 sps:$4 sm:$0xff]  }
 0x176   :  { %2801 = vmatprep.subr.bf16.mxu0 %v3838_v63  ;;  %v3899_v63 = vld [vmem:[#allocation2 + $0x428] ss:$24 sps:$4 sm:$0xff]  }
 0x179   :  { %2802 = vmatpush1.bf16.msra.mxu0 %v3836_v0  ;;  %v3902_v0 = vld [vmem:[#allocation2 + $0x100] ss:$24 sps:$4 sm:$0xff]  }
 0x17a   :  { %2803 = vmatprep.subr.bf16.mxu0 %v3844_v1  ;;  %v3907_v1 = vld [vmem:[#allocation2 + $0x3fc] ss:$24 sps:$4 sm:$0xff]  }
 0x17d   :  { %2804 = vmatpush2.bf16.msra.mxu0 %v3842_v2  ;;  %v3910_v2 = vld [vmem:[#allocation2 + $0xd4] ss:$24 sps:$4 sm:$0xff]  }
 0x17e   :  { %2805 = vmatprep.subr.bf16.mxu0 %v3850_v3  ;;  %v3908_v3 = vld [vmem:[#allocation2 + $0xd0] ss:$24 sps:$4 sm:$0xff]  }
 0x181   :  { %2806 = vmatpush2.bf16.msra.mxu0 %v3848_v5  ;;  %v3913_v5 = vld [vmem:[#allocation2 + $0x3cc] ss:$24 sps:$4 sm:$0xff]  }
 0x182   :  { %2807 = vmatprep.subr.bf16.mxu0 %v3856_v6  ;;  %v3916_v6 = vld [vmem:[#allocation2 + $0xa4] ss:$24 sps:$4 sm:$0xff]  }
 0x185   :  { %2808 = vmatpush2.bf16.msra.mxu0 %v3854_v8  ;;  %v3914_v8 = vld [vmem:[#allocation2 + $0xa0] ss:$24 sps:$4 sm:$0xff]  }
 0x186   :  { %2809 = vmatprep.subr.bf16.mxu0 %v3862_v10  ;;  %v3919_v10 = vld [vmem:[#allocation2 + $0x39c] ss:$24 sps:$4 sm:$0xff]  }
 0x189   :  { %2810 = vmatpush2.bf16.msra.mxu0 %v3860_v12  ;;  %v3917_v12 = vld [vmem:[#allocation2 + $0x398] ss:$24 sps:$4 sm:$0xff]  }
 0x18a   :  { %2811 = vmatprep.subr.bf16.mxu0 %v3868_v13  ;;  %v3920_v13 = vld [vmem:[#allocation2 + $0x70] ss:$24 sps:$4 sm:$0xff]  }
 0x18d   :  { %2812 = vmatpush2.bf16.msra.mxu0 %v3866_v20  ;;  %v3928_v20 = vld [vmem:[#allocation2 + $0x44] ss:$24 sps:$4 sm:$0xff]  }
 0x18e   :  { %v1453_v24 = vpop.f32.mrf.mxu0  ;;  %2813 = vmatprep.subr.bf16.mxu0 %v3874_v51  ;;  %v3923_v51 = vld [vmem:[#allocation2 + $0x368] ss:$24 sps:$4 sm:$0xff]  }
 0x18f   :  { %v1496_v25 = vpop.f32.mrf.mxu1  ;;  %v1454_v17 = vadd.f32 %v1453_v24, %v1411_v30  ;;  %v3932_v24 = vld [vmem:[#allocation2 + $0x10] ss:$24 sps:$4 sm:$0xff]   ;;  %v3946_v30 = vld [vmem:[#allocation2 + $0x2b4] ss:$24 sps:$4 sm:$0xff]  }
 0x190   :  { %v1455_v28 = vpop.f32.mrf.mxu0 }
 0x191   :  { %v1498_v29 = vpop.f32.mrf.mxu1  ;;  %v1456_v32 = vadd.f32 %v1455_v28, %v1413_v27  ;;  %2814 = vmatpush2.bf16.msra.mxu0 %v3872_v23  ;;  %v1497_v48 = vadd.f32 %v1496_v25, %v1454_v17  ;;  %v3929_v23 = vld [vmem:[#allocation2 + $0x338] ss:$24 sps:$4 sm:$0xff]   ;;  %v3937_v25 = vld [vmem:[#allocation2 + $0x30c] ss:$24 sps:$4 sm:$0xff]   ;;  %v3935_v27 = vld [vmem:[#allocation2 + $0x308] ss:$24 sps:$4 sm:$0xff]  }
 0x192   :  { %v1457_v34 = vpop.f32.mrf.mxu0  ;;  %2815 = vmatprep.subr.bf16.mxu0 %v3880_v26  ;;  %v3940_v26 = vld [vmem:[#allocation2 + $0x2e4] ss:$24 sps:$4 sm:$0xff]   ;;  %v3938_v28 = vld [vmem:[#allocation2 + $0x2e0] ss:$24 sps:$4 sm:$0xff]   ;;  %v3958_v17 = vld [vmem:[#allocation2 + $0x254] ss:$24 sps:$4 sm:$0xff]  }
 0x193   :  { %v1500_v35 = vpop.f32.mrf.mxu1  ;;  %v1458_v38 = vadd.f32 %v1457_v34, %v1415_v31  ;;  %v1499_v40 = vadd.f32 %v1498_v29, %v1456_v32  ;;  %v1507_v56 = vmax.f32 %v1497_v48, 0.0  ;;  %v3943_v29 = vld [vmem:[#allocation2 + $0x5dc] ss:$24 sps:$4 sm:$0xff]   ;;  %v3941_v31 = vld [vmem:[#allocation2 + $0x5d8] ss:$24 sps:$4 sm:$0xff]  }
 0x194   :  { %v1459_v39 = vpop.f32.mrf.mxu0  ;;  %v3944_v32 = vld [vmem:[#allocation2 + $0x2b0] ss:$24 sps:$4 sm:$0xff]   ;;  %v3952_v34 = vld [vmem:[#allocation2 + $0x284] ss:$24 sps:$4 sm:$0xff]  }
 0x195   :  { %v1501_v41 = vadd.f32 %v1500_v35, %v1458_v38  ;;  %v1460_v42 = vadd.f32 %v1459_v39, %v1417_v37  ;;  %2816 = vmatpush2.bf16.msra.mxu0 %v3878_v33  ;;  %v1502_v45 = vpop.f32.mrf.mxu1  ;;  %v1508_v50 = vmax.f32 %v1499_v40, 0.0  ;;  %v3949_v33 = vld [vmem:[#allocation2 + $0x5ac] ss:$24 sps:$4 sm:$0xff]   ;;  %v3947_v35 = vld [vmem:[#allocation2 + $0x5a8] ss:$24 sps:$4 sm:$0xff]  }
 0x196   :  { %2817 = vmatprep.subr.bf16.mxu0 %v3886_v36  ;;  %v3950_v36 = vld [vmem:[#allocation2 + $0x280] ss:$24 sps:$4 sm:$0xff]   ;;  %v3955_v37 = vld [vmem:[#allocation2 + $0x57c] ss:$24 sps:$4 sm:$0xff]   ;;  %v3956_v39 = vld [vmem:[#allocation2 + $0x250] ss:$24 sps:$4 sm:$0xff]  }
 0x197   :  { %v1503_v49 = vadd.f32 %v1502_v45, %v1460_v42  ;;  %v1511_v52 = vmax.f32 %v1501_v41, 0.0  ;;  %v3953_v38 = vld [vmem:[#allocation2 + $0x578] ss:$24 sps:$4 sm:$0xff]   ;;  %v3961_v40 = vld [vmem:[#allocation2 + $0x54c] ss:$24 sps:$4 sm:$0xff]  }
 0x198   :  { %v3964_v41 = vld [vmem:[#allocation2 + $0x224] ss:$24 sps:$4 sm:$0xff]   ;;  %v3959_v42 = vld [vmem:[#allocation2 + $0x548] ss:$24 sps:$4 sm:$0xff]   ;;  %v3965_v48 = vld [vmem:[#allocation2 + $0x518] ss:$24 sps:$4 sm:$0xff]  }
 0x199   :  { %v1512_v53 = vmax.f32 %v1503_v49, 0.0  ;;  %2818 = vmatpush2.bf16.msra.mxu0 %v3884_v43  ;;  %v4751_v59 = vpack.c.bf16 %v1511_v52, %v1507_v56  ;;  %v3962_v43 = vld [vmem:[#allocation2 + $0x220] ss:$24 sps:$4 sm:$0xff]   ;;  %v3967_v45 = vld [vmem:[#allocation2 + $0x51c] ss:$24 sps:$4 sm:$0xff]  }
 0x19a   :  { %2873 = vmatprep.subr.bf16.mxu0 %v3892_v47  ;;  %v3970_v47 = vld [vmem:[#allocation2 + $0x1f4] ss:$24 sps:$4 sm:$0xff]   ;;  %v3968_v49 = vld [vmem:[#allocation2 + $0x1f0] ss:$24 sps:$4 sm:$0xff]   ;;  %v3976_v52 = vld [vmem:[#allocation2 + $0x1c4] ss:$24 sps:$4 sm:$0xff]  }
 0x19b   :  { %v4748_v57 = vpack.c.bf16 %v1512_v53, %v1508_v50  ;;  %v3973_v50 = vld [vmem:[#allocation2 + $0x4ec] ss:$24 sps:$4 sm:$0xff]   ;;  %v3971_v53 = vld [vmem:[#allocation2 + $0x4e8] ss:$24 sps:$4 sm:$0xff]  }
 0x19c   :  { %2820 = vmatmul.mubr.bf16.vlgmr.msra.gmra.mxu0 %v4729_v46  ;;  %v3982_v56 = vld [vmem:[#allocation2 + $0x194] ss:$24 sps:$4 sm:$0xff]  }
 0x19d   :  { %2874 = vmatpush1.bf16.msra.mxu0 %v3890_v54  ;;  %2905 = vmatprep.mubr.bf16.mxu0 %v4727_v44  ;;  %v3905_v44 = vld [vmem:[#allocation2 + $0x3f8] ss:$24 sps:$4 sm:$0xff]  }
 0x19e   :  { %2776 = vmatprep.mubr.bf16.mxu1 %v4748_v57  ;;  %2875 = vmatprep.subr.bf16.mxu0 %v3898_v55  ;;  %v3974_v54 = vld [vmem:[#allocation2 + $0x1c0] ss:$24 sps:$4 sm:$0xff]   ;;  %v3979_v55 = vld [vmem:[#allocation2 + $0x4bc] ss:$24 sps:$4 sm:$0xff]  }
 0x19f   :  { %2777 = vmatmul.mubr.bf16.vlgmr.msra.gmra.mxu1 %v4751_v59 }
 0x1a0   :  { %2831 = vmatpush1.bf16.msra.mxu1 %v3893_v58  ;;  %2862 = vmatprep.mubr.bf16.mxu1 %v4748_v57  ;;  %v3977_v58 = vld [vmem:[#allocation2 + $0x4b8] ss:$24 sps:$4 sm:$0xff]  }
 0x1a1   :  { %2876 = vmatpush1.bf16.msra.mxu0 %v3896_v60  ;;  %2832 = vmatprep.subr.bf16.mxu1 %v3901_v61  ;;  %v3980_v60 = vld [vmem:[#allocation2 + $0x190] ss:$24 sps:$4 sm:$0xff]   ;;  %v3985_v61 = vld [vmem:[#allocation2 + $0x48c] ss:$24 sps:$4 sm:$0xff]  }
 0x1a2   :  { %2877 = vmatprep.subr.bf16.mxu0 %v3904_v62  ;;  %v3983_v62 = vld [vmem:[#allocation2 + $0x488] ss:$24 sps:$4 sm:$0xff]  }
 0x1a4   :  { %2833 = vmatpush1.bf16.msra.mxu1 %v3899_v63  ;;  %v3988_v63 = vld [vmem:[#allocation2 + $0x464] ss:$24 sps:$4 sm:$0xff]  }
 0x1a5   :  { %2878 = vmatpush1.bf16.msra.mxu0 %v3902_v0  ;;  %2834 = vmatprep.subr.bf16.mxu1 %v3907_v1  ;;  %v3986_v0 = vld [vmem:[#allocation2 + $0x460] ss:$24 sps:$4 sm:$0xff]   ;;  %v3991_v1 = vld [vmem:[#allocation2 + $0x434] ss:$24 sps:$4 sm:$0xff]  }
 0x1a6   :  { %2879 = vmatprep.subr.bf16.mxu0 %v3910_v2  ;;  %v3989_v2 = vld [vmem:[#allocation2 + $0x430] ss:$24 sps:$4 sm:$0xff]  }
 0x1a8   :  { %2835 = vmatpush1.bf16.msra.mxu1 %v3905_v44  ;;  %v3994_v44 = vld [vmem:[#allocation2 + $0x404] ss:$24 sps:$4 sm:$0xff]  }
 0x1a9   :  { %2880 = vmatpush1.bf16.msra.mxu0 %v3908_v3  ;;  %2836 = vmatprep.subr.bf16.mxu1 %v3913_v5  ;;  %v3992_v3 = vld [vmem:[#allocation2 + $0x400] ss:$24 sps:$4 sm:$0xff]   ;;  %v3997_v5 = vld [vmem:[#allocation2 + $0x3d4] ss:$24 sps:$4 sm:$0xff]  }
 0x1aa   :  { %2881 = vmatprep.subr.bf16.mxu0 %v3916_v6  ;;  %v3995_v6 = vld [vmem:[#allocation2 + $0x3d0] ss:$24 sps:$4 sm:$0xff]  }
 0x1ac   :  { %2837 = vmatpush1.bf16.msra.mxu1 %v3911_v7  ;;  %v4000_v7 = vld [vmem:[#allocation2 + $0x3a4] ss:$24 sps:$4 sm:$0xff]  }
 0x1ad   :  { %2882 = vmatpush1.bf16.msra.mxu0 %v3914_v8  ;;  %2838 = vmatprep.subr.bf16.mxu1 %v3919_v10  ;;  %v4003_v8 = vld [vmem:[#allocation2 + $0x374] ss:$24 sps:$4 sm:$0xff]   ;;  %v4001_v10 = vld [vmem:[#allocation2 + $0x370] ss:$24 sps:$4 sm:$0xff]  }
 0x1ae   :  { %2883 = vmatprep.subr.bf16.mxu0 %v3922_v11  ;;  %v4006_v11 = vld [vmem:[#allocation2 + $0x344] ss:$24 sps:$4 sm:$0xff]  }
 0x1b0   :  { %2839 = vmatpush1.bf16.msra.mxu1 %v3917_v12  ;;  %v4009_v12 = vld [vmem:[#allocation2 + $0x314] ss:$24 sps:$4 sm:$0xff]  }
 0x1b1   :  { %2884 = vmatpush1.bf16.msra.mxu0 %v3920_v13  ;;  %2840 = vmatprep.subr.bf16.mxu1 %v3925_v18  ;;  %v4007_v13 = vld [vmem:[#allocation2 + $0x310] ss:$24 sps:$4 sm:$0xff]   ;;  %v4012_v18 = vld [vmem:[#allocation2 + $0x5e4] ss:$24 sps:$4 sm:$0xff]  }
 0x1b2   :  { %2885 = vmatprep.subr.bf16.mxu0 %v3928_v20  ;;  %v4010_v20 = vld [vmem:[#allocation2 + $0x5e0] ss:$24 sps:$4 sm:$0xff]  }
 0x1b4   :  { %2841 = vmatpush1.bf16.msra.mxu1 %v3923_v51  ;;  %v4015_v51 = vld [vmem:[#allocation2 + $0x5b4] ss:$24 sps:$4 sm:$0xff]  }
 0x1b5   :  { %2886 = vmatpush1.bf16.msra.mxu0 %v3926_v9  ;;  %2842 = vmatprep.subr.bf16.mxu1 %v3931_v21  ;;  %v4013_v9 = vld [vmem:[#allocation2 + $0x5b0] ss:$24 sps:$4 sm:$0xff]   ;;  %v4018_v21 = vld [vmem:[#allocation2 + $0x584] ss:$24 sps:$4 sm:$0xff]  }
 0x1b6   :  { %2887 = vmatprep.subr.bf16.mxu0 %v3934_v22  ;;  %v4016_v22 = vld [vmem:[#allocation2 + $0x580] ss:$24 sps:$4 sm:$0xff]  }
 0x1b8   :  { %2843 = vmatpush1.bf16.msra.mxu1 %v3929_v23  ;;  %v4021_v23 = vld [vmem:[#allocation2 + $0x554] ss:$24 sps:$4 sm:$0xff]  }
 0x1b9   :  { %2888 = vmatpush1.bf16.msra.mxu0 %v3932_v24  ;;  %2844 = vmatprep.subr.bf16.mxu1 %v3937_v25  ;;  %v4019_v24 = vld [vmem:[#allocation2 + $0x550] ss:$24 sps:$4 sm:$0xff]   ;;  %v4024_v25 = vld [vmem:[#allocation2 + $0x524] ss:$24 sps:$4 sm:$0xff]  }
 0x1ba   :  { %2889 = vmatprep.subr.bf16.mxu0 %v3940_v26  ;;  %v4022_v26 = vld [vmem:[#allocation2 + $0x520] ss:$24 sps:$4 sm:$0xff]  }
 0x1bc   :  { %2845 = vmatpush1.bf16.msra.mxu1 %v3935_v27  ;;  %v4027_v27 = vld [vmem:[#allocation2 + $0x4f4] ss:$24 sps:$4 sm:$0xff]  }
 0x1bd   :  { %2890 = vmatpush2.bf16.msra.mxu0 %v3938_v28  ;;  %2846 = vmatprep.subr.bf16.mxu1 %v3943_v29  ;;  %v4025_v28 = vld [vmem:[#allocation2 + $0x4f0] ss:$24 sps:$4 sm:$0xff]   ;;  %v4030_v29 = vld [vmem:[#allocation2 + $0x4c4] ss:$24 sps:$4 sm:$0xff]  }
 0x1be   :  { %2891 = vmatprep.subr.bf16.mxu0 %v3946_v30  ;;  %v4028_v30 = vld [vmem:[#allocation2 + $0x4c0] ss:$24 sps:$4 sm:$0xff]  }
 0x1c0   :  { %2847 = vmatpush2.bf16.msra.mxu1 %v3941_v31  ;;  %v4033_v31 = vld [vmem:[#allocation2 + $0x494] ss:$24 sps:$4 sm:$0xff]  }
 0x1c1   :  { %2892 = vmatpush2.bf16.msra.mxu0 %v3944_v32  ;;  %2848 = vmatprep.subr.bf16.mxu1 %v3949_v33  ;;  %v4031_v32 = vld [vmem:[#allocation2 + $0x490] ss:$24 sps:$4 sm:$0xff]  }
 0x1c2   :  { %2893 = vmatprep.subr.bf16.mxu0 %v3952_v34  ;;  %v4764_v34 = vld [vmem:[%s4821_s5] sm:$0x3f] }
 0x1c4   :  { %2849 = vmatpush2.bf16.msra.mxu1 %v3947_v35 }
 0x1c5   :  { %2894 = vmatpush2.bf16.msra.mxu0 %v3950_v36  ;;  %2850 = vmatprep.subr.bf16.mxu1 %v3955_v37  ;;  %v1714_v36 = vrot.slane %v4764_v34, %v239_v4  ;;  %v1718_v37 = vrot.slane %v4764_v34, %v243_v16 }
 0x1c6   :  { %2895 = vmatprep.subr.bf16.mxu0 %v3958_v17 }
 0x1c8   :  { %2851 = vmatpush2.bf16.msra.mxu1 %v3953_v38 }
 0x1c9   :  { %2896 = vmatpush2.bf16.msra.mxu0 %v3956_v39  ;;  %2852 = vmatprep.subr.bf16.mxu1 %v3961_v40 }
 0x1ca   :  { %2897 = vmatprep.subr.bf16.mxu0 %v3964_v41  ;;  %v4772_v41 = vpop.permute.xlu0 %2975 }
 0x1cc   :  { %2853 = vmatpush2.bf16.msra.mxu1 %v3959_v42 }
 0x1cd   :  { %2898 = vmatpush2.bf16.msra.mxu0 %v3962_v43  ;;  %2854 = vmatprep.subr.bf16.mxu1 %v3967_v45 }
 0x1ce   :  { %2899 = vmatprep.subr.bf16.mxu0 %v3970_v47 }
 0x1d0   :  { %2855 = vmatpush2.bf16.msra.mxu1 %v3965_v48 }
 0x1d1   :  { %2900 = vmatpush2.bf16.msra.mxu0 %v3968_v49  ;;  %2856 = vmatprep.subr.bf16.mxu1 %v3973_v50 }
 0x1d2   :  { %2901 = vmatprep.subr.bf16.mxu0 %v3976_v52 }
 0x1d4   :  { %2857 = vmatpush2.bf16.msra.mxu1 %v3971_v53 }
 0x1d5   :  { %2902 = vmatpush2.bf16.msra.mxu0 %v3974_v54  ;;  %2858 = vmatprep.subr.bf16.mxu1 %v3979_v55 }
 0x1d6   :  { %2903 = vmatprep.subr.bf16.mxu0 %v3982_v56 }
 0x1d8   :  { %2859 = vmatpush2.bf16.msra.mxu1 %v3977_v58  ;;  %v4776_v58 = vpop.permute.xlu0 %2980 }
 0x1d9   :  { %2904 = vmatpush2.bf16.msra.mxu0 %v3980_v60  ;;  %2860 = vmatprep.subr.bf16.mxu1 %v3985_v61 }
 0x1dc   :  { %2861 = vmatpush2.bf16.msra.mxu1 %v3983_v62  ;;  %2906 = vmatmul.mubr.bf16.vlgmr.msra.gmra.mxu0 %v4729_v46  ;;  %v3998_v46 = vld [vmem:[#allocation2 + $0x3a0] ss:$24 sps:$4 sm:$0xff]  }
 0x1dd   :  { %2916 = vmatprep.subr.bf16.mxu1 %v3988_v63 }
 0x1df   :  { %2863 = vmatmul.mubr.bf16.vlgmr.msra.gmra.mxu1 %v4751_v59 }
 0x1e0   :  { %2917 = vmatpush1.bf16.msra.mxu1 %v3986_v0  ;;  %2948 = vmatprep.mubr.bf16.mxu1 %v4748_v57  ;;  %v4004_v57 = vld [vmem:[#allocation2 + $0x340] ss:$24 sps:$4 sm:$0xff]  }
 0x1e1   :  { %2918 = vmatprep.subr.bf16.mxu1 %v3991_v1 }
 0x1e4   :  { %2919 = vmatpush1.bf16.msra.mxu1 %v3989_v2 }
 0x1e5   :  { %2920 = vmatprep.subr.bf16.mxu1 %v3994_v44  ;;  %v1722_v44 = vrot.slane %v4764_v34, %v247_v19 }
 0x1e8   :  { %2921 = vmatpush1.bf16.msra.mxu1 %v3992_v3  ;;  %v1726_v3 = vrot.slane %v4764_v34, %v251_v15 }
 0x1e9   :  { %2922 = vmatprep.subr.bf16.mxu1 %v3997_v5 }
 0x1ec   :  { %2923 = vmatpush1.bf16.msra.mxu1 %v3995_v6 }
 0x1ed   :  { %2924 = vmatprep.subr.bf16.mxu1 %v4000_v7 }
 0x1f0   :  { %2925 = vmatpush1.bf16.msra.mxu1 %v3998_v46 }
 0x1f1   :  { %2926 = vmatprep.subr.bf16.mxu1 %v4003_v8 }
 0x1f4   :  { %2927 = vmatpush1.bf16.msra.mxu1 %v4001_v10 }
 0x1f5   :  { %2928 = vmatprep.subr.bf16.mxu1 %v4006_v11 }
 0x1f8   :  { %2929 = vmatpush1.bf16.msra.mxu1 %v4004_v57 }
 0x1f9   :  { %2930 = vmatprep.subr.bf16.mxu1 %v4009_v12 }
 0x1fc   :  { %2931 = vmatpush1.bf16.msra.mxu1 %v4007_v13 }
 0x1fd   :  { %2932 = vmatprep.subr.bf16.mxu1 %v4012_v18 }
 0x200   :  { %2933 = vmatpush2.bf16.msra.mxu1 %v4010_v20 }
 0x201   :  { %2934 = vmatprep.subr.bf16.mxu1 %v4015_v51 }
 0x204   :  { %2935 = vmatpush2.bf16.msra.mxu1 %v4013_v9 }
 0x205   :  { %2936 = vmatprep.subr.bf16.mxu1 %v4018_v21 }
 0x208   :  { %2937 = vmatpush2.bf16.msra.mxu1 %v4016_v22 }
 0x209   :  { %2938 = vmatprep.subr.bf16.mxu1 %v4021_v23 }
 0x20c   :  { %2939 = vmatpush2.bf16.msra.mxu1 %v4019_v24 }
 0x20d   :  { %2940 = vmatprep.subr.bf16.mxu1 %v4024_v25 }
 0x210   :  { %2941 = vmatpush2.bf16.msra.mxu1 %v4022_v26 }
 0x211   :  { %2942 = vmatprep.subr.bf16.mxu1 %v4027_v27 }
 0x214   :  { %2943 = vmatpush2.bf16.msra.mxu1 %v4025_v28 }
 0x215   :  { %2944 = vmatprep.subr.bf16.mxu1 %v4030_v29 }
 0x218   :  { %2945 = vmatpush2.bf16.msra.mxu1 %v4028_v30  ;;  %v1729_v30 = vsub.s32 4, %v4712_v14 }
 0x219   :  { %2946 = vmatprep.subr.bf16.mxu1 %v4033_v31  ;;  %v1733_v31 = vsub.s32 5, %v4712_v14 }
 0x21c   :  { %2947 = vmatpush2.bf16.msra.mxu1 %v4031_v32  ;;  %v2735_v33 = vpop.f32.mrf.mxu0 }
 0x21d   :  { %v2736_v38 = vadd.f32 %v2735_v33, %v1714_v36  ;;  %v1730_v33 = vrot.slane %v4764_v34, %v1729_v30 }
 0x21e   :  { %v2737_v35 = vpop.f32.mrf.mxu0 }
 0x21f   :  { %2949 = vmatmul.mubr.bf16.vlgmr.msra.gmra.mxu1 %v4751_v59  ;;  %v2738_v40 = vadd.f32 %v2737_v35, %v1718_v37  ;;  %v1734_v35 = vrot.slane %v4764_v34, %v1733_v31 }
 0x220   :  { %v2739_v17 = vpop.f32.mrf.mxu0 }
 0x221   :  { %v2740_v45 = vadd.f32 %v2739_v17, %v1714_v36 }
 0x222   :  { %v2741_v42 = vpop.f32.mrf.mxu0 }
 0x223   :  { %v2742_v50 = vadd.f32 %v2741_v42, %v1718_v37 }
 0x25c   :  { %v2821_v1 = vpop.f32.mrf.mxu0 }
 0x25d   :  { %v2822_v6 = vadd.f32 %v2821_v1, %v1722_v44 }
 0x25e   :  { %v2823_v2 = vpop.f32.mrf.mxu0 }
 0x25f   :  { %v2778_v39 = vpop.f32.mrf.mxu1  ;;  %v2824_v46 = vadd.f32 %v2823_v2, %v1726_v3 }
 0x260   :  { %v2779_v59 = vadd.f32 %v2778_v39, %v2736_v38  ;;  %v2825_v5 = vpop.f32.mrf.mxu0 }
 0x261   :  { %v2780_v43 = vpop.f32.mrf.mxu1  ;;  %v2826_v57 = vadd.f32 %v2825_v5, %v1722_v44 }
 0x262   :  { %v2959_v47 = vmax.f32 %v2779_v59, 0.0  ;;  %v2781_v48 = vadd.f32 %v2780_v43, %v2738_v40  ;;  %v2827_v10 = vpop.f32.mrf.mxu0 }
 0x263   :  { %v2782_v49 = vpop.f32.mrf.mxu1  ;;  %v2828_v20 = vadd.f32 %v2827_v10, %v1726_v3 }
 0x264   :  { %v2960_v52 = vmax.f32 %v2781_v48, 0.0  ;;  %v2783_v4 = vadd.f32 %v2782_v49, %v2740_v45  ;;  %v2983_v54 = vmul.f32 %v4772_v41, %v2959_v47 }
 0x265   :  { %v2784_v53 = vpop.f32.mrf.mxu1 }
 0x266   :  { %v2984_v16 = vmul.f32 %v4772_v41, %v2960_v52  ;;  %v2965_v55 = vmax.f32 %v2783_v4, 0.0  ;;  %v2785_v56 = vadd.f32 %v2784_v53, %v2742_v50 }
 0x268   :  { %v3438_v60 = vpack.c.bf16 %v2984_v16, %v2983_v54  ;;  %v2966_v61 = vmax.f32 %v2785_v56, 0.0  ;;  %v2989_v62 = vmul.f32 %v4776_v58, %v2965_v55 }
 0x26a   :  { %3031 = vst [vmem:[%s4822_s6] sm:$0xff] %v3438_v60  ;;  %v2990_v63 = vmul.f32 %v4776_v58, %v2966_v61 }
 0x26c   :  { %v3441_v0 = vpack.c.bf16 %v2990_v63, %v2989_v62 }
 0x26e   :  { %3034 = vst [vmem:[%s4822_s6 + $0x18] sm:$0xff] %v3441_v0 }
 0x29c   :  { %v2907_v29 = vpop.f32.mrf.mxu0 }
 0x29d   :  { %v2908_v37 = vadd.f32 %v2907_v29, %v1730_v33 }
 0x29e   :  { %v2909_v32 = vpop.f32.mrf.mxu0 }
 0x29f   :  { %v2864_v7 = vpop.f32.mrf.mxu1  ;;  %v2910_v38 = vadd.f32 %v2909_v32, %v1734_v35 }
 0x2a0   :  { %v2865_v8 = vadd.f32 %v2864_v7, %v2822_v6  ;;  %v2911_v36 = vpop.f32.mrf.mxu0 }
 0x2a1   :  { %v2866_v11 = vpop.f32.mrf.mxu1  ;;  %v2912_v42 = vadd.f32 %v2911_v36, %v1730_v33 }
 0x2a2   :  { %v2961_v12 = vmax.f32 %v2865_v8, 0.0  ;;  %v2867_v13 = vadd.f32 %v2866_v11, %v2824_v46  ;;  %v2913_v40 = vpop.f32.mrf.mxu0 }
 0x2a3   :  { %v2868_v18 = vpop.f32.mrf.mxu1  ;;  %v2914_v48 = vadd.f32 %v2913_v40, %v1734_v35 }
 0x2a4   :  { %v2962_v51 = vmax.f32 %v2867_v13, 0.0  ;;  %v2869_v9 = vadd.f32 %v2868_v18, %v2826_v57  ;;  %v2985_v19 = vmul.f32 %v4772_v41, %v2961_v12 }
 0x2a5   :  { %v2870_v21 = vpop.f32.mrf.mxu1 }
 0x2a6   :  { %v2986_v22 = vmul.f32 %v4772_v41, %v2962_v51  ;;  %v2967_v15 = vmax.f32 %v2869_v9, 0.0  ;;  %v2871_v23 = vadd.f32 %v2870_v21, %v2828_v20 }
 0x2a8   :  { %v3439_v24 = vpack.c.bf16 %v2986_v22, %v2985_v19  ;;  %v2968_v25 = vmax.f32 %v2871_v23, 0.0  ;;  %v2991_v26 = vmul.f32 %v4776_v58, %v2967_v15 }
 0x2aa   :  { %3032 = vst [vmem:[%s4822_s6 + $0x8] sm:$0xff] %v3439_v24  ;;  %v2992_v27 = vmul.f32 %v4776_v58, %v2968_v25 }
 0x2ac   :  { %v3442_v28 = vpack.c.bf16 %v2992_v27, %v2991_v26 }
 0x2ae   :  { %3035 = vst [vmem:[%s4822_s6 + $0x20] sm:$0xff] %v3442_v28 }
 0x2df   :  { %v2950_v17 = vpop.f32.mrf.mxu1 }
 0x2e0   :  { %v2951_v39 = vadd.f32 %v2950_v17, %v2908_v37 }
 0x2e1   :  { %v2952_v59 = vpop.f32.mrf.mxu1 }
 0x2e2   :  { %v2963_v43 = vmax.f32 %v2951_v39, 0.0  ;;  %v2953_v45 = vadd.f32 %v2952_v59, %v2910_v38 }
 0x2e3   :  { %v2954_v47 = vpop.f32.mrf.mxu1 }
 0x2e4   :  { %v2964_v49 = vmax.f32 %v2953_v45, 0.0  ;;  %v2955_v50 = vadd.f32 %v2954_v47, %v2912_v42  ;;  %v2987_v52 = vmul.f32 %v4772_v41, %v2963_v43 }
 0x2e5   :  { %v2956_v14 = vpop.f32.mrf.mxu1 }
 0x2e6   :  { %v2988_v4 = vmul.f32 %v4772_v41, %v2964_v49  ;;  %v2969_v34 = vmax.f32 %v2955_v50, 0.0  ;;  %v2957_v53 = vadd.f32 %v2956_v14, %v2914_v48 }
 0x2e8   :  { %v3440_v54 = vpack.c.bf16 %v2988_v4, %v2987_v52  ;;  %v2970_v16 = vmax.f32 %v2957_v53, 0.0  ;;  %v2993_v55 = vmul.f32 %v4776_v58, %v2969_v34 }
 0x2ea   :  { %3033 = vst [vmem:[%s4822_s6 + $0x10] sm:$0xff] %v3440_v54  ;;  %v2994_v56 = vmul.f32 %v4776_v58, %v2970_v16 }
 0x2ec   :  { %v3443_v60 = vpack.c.bf16 %v2994_v56, %v2993_v55 }
 0x2ee   :  { %3036 = vst [vmem:[%s4822_s6 + $0x28] sm:$0xff] %v3443_v60 }
 0x2ef   :  { %3041 = vsyncpa [#allocation3], 1 }

</bundles_post_ra>
